<compile_context>
chip_gen: v5e
topology: v5e:2x2
jax: 0.10.0
libtpu: 0.0.40
codegen_flags: <defaults>
</compile_context>

<pallas_src>
import math

import jax
import jax.numpy as jnp
from jax.experimental import pallas as pl
from jax.experimental.pallas import tpu as pltpu

# ---------------- synthetic (small) BART config ----------------
VOCAB = 50
PAD_IDX = 1
D_MODEL = 32
N_HEADS = 4
HEAD_DIM = D_MODEL // N_HEADS
FFN_DIM = 64
N_LAYERS = 2
MAX_POS = 64
POS_OFFSET = 2          # config.extra_pos_embeddings (LearnedPositionalEmbedding offset)
EMBED_SCALE = 1.0       # config.scale_embedding = False
LN_EPS = 1e-5
W3 = 3 * D_MODEL        # fused qkv width


# ---------------- in-kernel helpers ----------------
def _layer_norm(x, g, b, eps=LN_EPS):
    mu = jnp.mean(x, axis=-1, keepdims=True)
    var = jnp.mean((x - mu) ** 2, axis=-1, keepdims=True)
    return (x - mu) * jax.lax.rsqrt(var + eps) * g + b


def _erf(x):
    # Abramowitz-Stegun 7.1.26 rational approximation, |error| < 1.5e-7 (f32-exact
    # for practical purposes).  Uses only exp / mul / add, all VPU/EUP friendly.
    a1, a2, a3, a4, a5 = 0.254829592, -0.284496736, 1.421413741, -1.453152027, 1.061405429
    p = 0.3275911
    ax = jnp.abs(x)
    t = 1.0 / (1.0 + p * ax)
    poly = ((((a5 * t + a4) * t + a3) * t + a2) * t + a1) * t
    y = 1.0 - poly * jnp.exp(-ax * ax)
    return jnp.where(x >= 0.0, y, -y)


def _gelu(x):
    # exact erf-GELU (reference ACT2FN['gelu'])
    return 0.5 * x * (1.0 + _erf(x * (1.0 / math.sqrt(2.0))))


# ---------------- fused encoder kernel ----------------
def encoder_kernel(x_ref, mask_ref, embln_ref, wqkv_ref, wo_ref, w1_ref, w2_ref,
                   vec_ref, o_ref):
    E, F, H, hd = D_MODEL, FFN_DIM, N_HEADS, HEAD_DIM
    scaling = hd ** -0.5

    x = x_ref[...].astype(jnp.float32)            # (N, E), N = B*S
    amask = mask_ref[...]                         # (N, N) additive: 0 keep, -inf masked

    # layernorm_embedding
    x = _layer_norm(x, embln_ref[0:1, :], embln_ref[1:2, :])

    for l in range(N_LAYERS):                     # static unroll over layers
        wqkv = wqkv_ref[l]                        # (E, 3E)   (in, out) layout
        wo = wo_ref[l]                            # (E, E)
        w1 = w1_ref[l]                            # (E, F)
        w2 = w2_ref[l]                            # (F, E)
        vec = vec_ref[l]                          # (8, 3E) packed biases / LN params
        bqkv = vec[0:1, :]                        # (1, 3E)
        bo = vec[1:2, 0:E]
        b1 = vec[2:3, 0:F]
        b2 = vec[3:4, 0:E]
        ln1_g, ln1_b = vec[4:5, 0:E], vec[5:6, 0:E]
        ln2_g, ln2_b = vec[6:7, 0:E], vec[7:8, 0:E]

        # ---- self attention (post-norm, normalize_before=False) ----
        residual = x
        qkv = jnp.dot(x, wqkv, preferred_element_type=jnp.float32) + bqkv   # (N, 3E)
        q = qkv[:, 0:E] * scaling
        k = qkv[:, E:2 * E]
        v = qkv[:, 2 * E:3 * E]

        ctx_heads = []
        for h in range(H):                        # static unroll; scores are per-head
            lo = h * hd
            qh = q[:, lo:lo + hd]                 # (N, hd)
            kh = k[:, lo:lo + hd]
            vh = v[:, lo:lo + hd]
            s = jnp.dot(qh, kh.T, preferred_element_type=jnp.float32) + amask  # (N, N)
            s = s - jnp.max(s, axis=-1, keepdims=True)
            p = jnp.exp(s)
            p = p * pl.reciprocal(jnp.sum(p, axis=-1, keepdims=True), approx=True)
            ctx_heads.append(jnp.dot(p, vh, preferred_element_type=jnp.float32))
        ctx = jnp.concatenate(ctx_heads, axis=-1)                 # (N, E)
        attn = jnp.dot(ctx, wo, preferred_element_type=jnp.float32) + bo

        x = residual + attn
        x = _layer_norm(x, ln1_g, ln1_b)          # self_attn_layer_norm

        # ---- feed forward ----
        residual = x
        h1 = _gelu(jnp.dot(x, w1, preferred_element_type=jnp.float32) + b1)
        h2 = jnp.dot(h1, w2, preferred_element_type=jnp.float32) + b2
        x = residual + h2
        x = _layer_norm(x, ln2_g, ln2_b)          # final_layer_norm

        # reference: clamp whole tensor only if any inf/nan present (cheap at this size)
        is_bad = (x != x) | (jnp.abs(x) == jnp.inf)
        badf = jnp.max(jnp.where(is_bad, 1.0, 0.0))
        clamp = jnp.float32(jnp.finfo(jnp.float32).max - 1000.0)
        x = jnp.where(badf > 0.5, jnp.clip(x, -clamp, clamp), x)

    o_ref[...] = x


# ---------------- pallas_call wrapper ----------------
def run_encoder(x, amask, params):
    N, E = x.shape
    emb_ln = params["emb_ln"]
    wqkv, wo, w1, w2, vecs = (params["wqkv"], params["wo"], params["w1"],
                              params["w2"], params["vecs"])

    def full(a):
        return pl.BlockSpec(a.shape, lambda i, nd=a.ndim: (0,) * nd)

    return pl.pallas_call(
        encoder_kernel,
        out_shape=jax.ShapeDtypeStruct((N, E), jnp.float32),
        grid_spec=pltpu.PrefetchScalarGridSpec(
            num_scalar_prefetch=0,
            grid=(1,),                                     # single fused invocation
            in_specs=[full(x), full(amask), full(emb_ln),
                      full(wqkv), full(wo), full(w1), full(w2), full(vecs)],
            out_specs=pl.BlockSpec((N, E), lambda i: (0, 0)),
        ),
        compiler_params=pltpu.CompilerParams(dimension_semantics=("arbitrary",)),
    )(x, amask, emb_ln, wqkv, wo, w1, w2, vecs)


# ---------------- deterministic synthetic parameters ----------------
def init_params(key):
    keys = iter(jax.random.split(key, 128))

    def nrm(shape, scale=0.02):
        return (scale * jax.random.normal(next(keys), shape)).astype(jnp.float32)

    tok_emb = nrm((VOCAB, D_MODEL)).at[PAD_IDX].set(0.0)                 # padding_idx row zeroed
    pos_emb = nrm((MAX_POS + POS_OFFSET, D_MODEL)).at[PAD_IDX].set(0.0)
    emb_ln = jnp.concatenate([jnp.ones((1, D_MODEL)), jnp.zeros((1, D_MODEL))],
                             axis=0).astype(jnp.float32)                 # [gamma; beta]

    def pad_row(v):
        return jnp.pad(v, (0, W3 - v.shape[0]))[None, :]

    wqkv_l, wo_l, w1_l, w2_l, vec_l = [], [], [], [], []
    for _ in range(N_LAYERS):
        # all linear weights stored transposed as (in, out) so the kernel does x @ W + b
        wq, wk, wv = nrm((D_MODEL, D_MODEL)), nrm((D_MODEL, D_MODEL)), nrm((D_MODEL, D_MODEL))
        bq, bk, bv = nrm((D_MODEL,)), nrm((D_MODEL,)), nrm((D_MODEL,))
        wo, bo = nrm((D_MODEL, D_MODEL)), nrm((D_MODEL,))
        w1, b1 = nrm((D_MODEL, FFN_DIM)), nrm((FFN_DIM,))
        w2, b2 = nrm((FFN_DIM, D_MODEL)), nrm((D_MODEL,))
        ln1_g, ln1_b = jnp.ones((D_MODEL,), jnp.float32), jnp.zeros((D_MODEL,), jnp.float32)
        ln2_g, ln2_b = jnp.ones((D_MODEL,), jnp.float32), jnp.zeros((D_MODEL,), jnp.float32)

        wqkv_l.append(jnp.concatenate([wq, wk, wv], axis=1))             # (E, 3E) fused QKV
        wo_l.append(wo)
        w1_l.append(w1)
        w2_l.append(w2)
        vec_l.append(jnp.concatenate(
            [jnp.concatenate([bq, bk, bv])[None, :],
             pad_row(bo), pad_row(b1), pad_row(b2),
             pad_row(ln1_g), pad_row(ln1_b), pad_row(ln2_g), pad_row(ln2_b)],
            axis=0).astype(jnp.float32))                                 # (8, 3E)

    return dict(
        tok_emb=tok_emb, pos_emb=pos_emb, emb_ln=emb_ln,
        wqkv=jnp.stack(wqkv_l), wo=jnp.stack(wo_l),
        w1=jnp.stack(w1_l), w2=jnp.stack(w2_l), vecs=jnp.stack(vec_l))


# ---------------- BartEncoder.forward ----------------
def bart_encoder_forward(input_ids, attention_mask, params):
    B, S = input_ids.shape
    N = B * S

    # embedding lookups are gather ops -> plain JAX glue
    inputs_embeds = jnp.take(params["tok_emb"], input_ids, axis=0) * EMBED_SCALE   # (B, S, E)
    positions = jnp.arange(S, dtype=jnp.int32) + POS_OFFSET                        # LearnedPositionalEmbedding
    embed_pos = jnp.take(params["pos_emb"], positions, axis=0)                     # (S, E)
    x = (inputs_embeds + embed_pos[None, :, :]).astype(jnp.float32).reshape(N, D_MODEL)

    # invert_mask + masked_fill(-inf), plus block-diagonal batch separation for the
    # flattened (B*S) token axis: cross-batch pairs and padded keys get -inf.
    bidx = jnp.repeat(jnp.arange(B), S)                                            # (N,)
    key_pad = (attention_mask.reshape(N) == 0)
    keep = (bidx[:, None] == bidx[None, :]) & (~key_pad)[None, :]
    amask = jnp.where(keep, 0.0, -jnp.inf).astype(jnp.float32)                     # (N, N)

    out = run_encoder(x, amask, params)                                            # (N, E)
    # config.add_final_layer_norm = False -> no final layer_norm
    return out.reshape(B, S, D_MODEL)                                              # last_hidden_state


if __name__ == "__main__":
    key = jax.random.PRNGKey(0)
    pkey, ikey = jax.random.split(key)
    params = init_params(pkey)

    B, S = 2, 8
    input_ids = jax.random.randint(ikey, (B, S), 2, VOCAB)
    attention_mask = jnp.ones((B, S), jnp.int32).at[1, -2:].set(0)                 # pad tail of seq 1
    input_ids = jnp.where(attention_mask == 1, input_ids, PAD_IDX)

    out = bart_encoder_forward(input_ids, attention_mask, params)
    jax.block_until_ready(out)
    assert out.shape == (B, S, D_MODEL) and out.dtype == jnp.float32
    assert bool(jnp.all(jnp.isfinite(out)))
    print("KERNEL_OK")
</pallas_src>

<mosaic_0001>
module attributes {stable_mosaic.version = 11 : i64} {
  func.func @encoder_kernel(%arg0: i32, %arg1: memref<16x32xf32, #tpu.memory_space<vmem>>, %arg2: memref<16x16xf32, #tpu.memory_space<vmem>>, %arg3: memref<2x32xf32, #tpu.memory_space<vmem>>, %arg4: memref<2x32x96xf32, #tpu.memory_space<vmem>>, %arg5: memref<2x32x32xf32, #tpu.memory_space<vmem>>, %arg6: memref<2x32x64xf32, #tpu.memory_space<vmem>>, %arg7: memref<2x64x32xf32, #tpu.memory_space<vmem>>, %arg8: memref<2x8x96xf32, #tpu.memory_space<vmem>>, %arg9: memref<16x32xf32, #tpu.memory_space<vmem>>) attributes {dimension_semantics = [#tpu.dimension_semantics<arbitrary>], iteration_bounds = array<i64: 1>, scalar_prefetch = 0 : i64, scratch_operands = 0 : i64, tpu.core_type = #tpu.core_type<tc>, window_params = [{pipeline_mode = #tpu.pipeline_mode<synchronous>, transform_indices = @transform_0, window_bounds = array<i64: 16, 32>}, {pipeline_mode = #tpu.pipeline_mode<synchronous>, transform_indices = @transform_1, window_bounds = array<i64: 16, 16>}, {pipeline_mode = #tpu.pipeline_mode<synchronous>, transform_indices = @transform_2, window_bounds = array<i64: 2, 32>}, {pipeline_mode = #tpu.pipeline_mode<synchronous>, transform_indices = @transform_3, window_bounds = array<i64: 2, 32, 96>}, {pipeline_mode = #tpu.pipeline_mode<synchronous>, transform_indices = @transform_4, window_bounds = array<i64: 2, 32, 32>}, {pipeline_mode = #tpu.pipeline_mode<synchronous>, transform_indices = @transform_5, window_bounds = array<i64: 2, 32, 64>}, {pipeline_mode = #tpu.pipeline_mode<synchronous>, transform_indices = @transform_6, window_bounds = array<i64: 2, 64, 32>}, {pipeline_mode = #tpu.pipeline_mode<synchronous>, transform_indices = @transform_7, window_bounds = array<i64: 2, 8, 96>}, {pipeline_mode = #tpu.pipeline_mode<synchronous>, transform_indices = @transform_8, window_bounds = array<i64: 16, 32>}]} {
    %c0 = arith.constant 0 : index
    %c0_0 = arith.constant 0 : index
    %0 = vector.load %arg1[%c0, %c0_0] : memref<16x32xf32, #tpu.memory_space<vmem>>, vector<16x32xf32>
    %c0_1 = arith.constant 0 : index
    %c0_2 = arith.constant 0 : index
    %1 = vector.load %arg2[%c0_1, %c0_2] : memref<16x16xf32, #tpu.memory_space<vmem>>, vector<16x16xf32>
    %c0_3 = arith.constant 0 : index
    %c0_4 = arith.constant 0 : index
    %2 = vector.load %arg3[%c0_3, %c0_4] : memref<2x32xf32, #tpu.memory_space<vmem>>, vector<1x32xf32>
    %c1 = arith.constant 1 : index
    %c0_5 = arith.constant 0 : index
    %3 = vector.load %arg3[%c1, %c0_5] : memref<2x32xf32, #tpu.memory_space<vmem>>, vector<1x32xf32>
    %cst = arith.constant dense<0.000000e+00> : vector<16xf32>
    %4 = vector.multi_reduction <add>, %0, %cst [1] : vector<16x32xf32> to vector<16xf32>
    %5 = vector.shape_cast %4 : vector<16xf32> to vector<16x1xf32>
    %cst_6 = arith.constant 3.200000e+01 : f32
    %6 = vector.broadcast %cst_6 : f32 to vector<16x1xf32>
    %7 = arith.divf %5, %6 : vector<16x1xf32>
    %8 = vector.broadcast %7 : vector<16x1xf32> to vector<16x32xf32>
    %9 = arith.subf %0, %8 : vector<16x32xf32>
    %10 = arith.mulf %9, %9 : vector<16x32xf32>
    %cst_7 = arith.constant dense<0.000000e+00> : vector<16xf32>
    %11 = vector.multi_reduction <add>, %10, %cst_7 [1] : vector<16x32xf32> to vector<16xf32>
    %12 = vector.shape_cast %11 : vector<16xf32> to vector<16x1xf32>
    %cst_8 = arith.constant 3.200000e+01 : f32
    %13 = vector.broadcast %cst_8 : f32 to vector<16x1xf32>
    %14 = arith.divf %12, %13 : vector<16x1xf32>
    %15 = vector.broadcast %7 : vector<16x1xf32> to vector<16x32xf32>
    %16 = arith.subf %0, %15 : vector<16x32xf32>
    %cst_9 = arith.constant 9.99999974E-6 : f32
    %17 = vector.broadcast %cst_9 : f32 to vector<16x1xf32>
    %18 = arith.addf %14, %17 : vector<16x1xf32>
    %19 = math.rsqrt %18 : vector<16x1xf32>
    %20 = vector.broadcast %19 : vector<16x1xf32> to vector<16x32xf32>
    %21 = arith.mulf %16, %20 : vector<16x32xf32>
    %22 = vector.broadcast %2 : vector<1x32xf32> to vector<16x32xf32>
    %23 = arith.mulf %21, %22 : vector<16x32xf32>
    %24 = vector.broadcast %3 : vector<1x32xf32> to vector<16x32xf32>
    %25 = arith.addf %23, %24 : vector<16x32xf32>
    %c0_10 = arith.constant 0 : index
    %c0_11 = arith.constant 0 : index
    %c0_12 = arith.constant 0 : index
    %26 = vector.load %arg4[%c0_10, %c0_11, %c0_12] : memref<2x32x96xf32, #tpu.memory_space<vmem>>, vector<1x32x96xf32>
    %27 = vector.shape_cast %26 : vector<1x32x96xf32> to vector<32x96xf32>
    %c0_13 = arith.constant 0 : index
    %c0_14 = arith.constant 0 : index
    %c0_15 = arith.constant 0 : index
    %28 = vector.load %arg5[%c0_13, %c0_14, %c0_15] : memref<2x32x32xf32, #tpu.memory_space<vmem>>, vector<1x32x32xf32>
    %29 = vector.shape_cast %28 : vector<1x32x32xf32> to vector<32x32xf32>
    %c0_16 = arith.constant 0 : index
    %c0_17 = arith.constant 0 : index
    %c0_18 = arith.constant 0 : index
    %30 = vector.load %arg6[%c0_16, %c0_17, %c0_18] : memref<2x32x64xf32, #tpu.memory_space<vmem>>, vector<1x32x64xf32>
    %31 = vector.shape_cast %30 : vector<1x32x64xf32> to vector<32x64xf32>
    %c0_19 = arith.constant 0 : index
    %c0_20 = arith.constant 0 : index
    %c0_21 = arith.constant 0 : index
    %32 = vector.load %arg7[%c0_19, %c0_20, %c0_21] : memref<2x64x32xf32, #tpu.memory_space<vmem>>, vector<1x64x32xf32>
    %33 = vector.shape_cast %32 : vector<1x64x32xf32> to vector<64x32xf32>
    %c0_22 = arith.constant 0 : index
    %c0_23 = arith.constant 0 : index
    %c0_24 = arith.constant 0 : index
    %34 = vector.load %arg8[%c0_22, %c0_23, %c0_24] : memref<2x8x96xf32, #tpu.memory_space<vmem>>, vector<1x8x96xf32>
    %35 = vector.shape_cast %34 : vector<1x8x96xf32> to vector<8x96xf32>
    %36 = vector.extract_strided_slice %35 {offsets = [0, 0], sizes = [1, 96], strides = [1, 1]} : vector<8x96xf32> to vector<1x96xf32>
    %37 = vector.extract_strided_slice %35 {offsets = [1, 0], sizes = [1, 32], strides = [1, 1]} : vector<8x96xf32> to vector<1x32xf32>
    %38 = vector.extract_strided_slice %35 {offsets = [2, 0], sizes = [1, 64], strides = [1, 1]} : vector<8x96xf32> to vector<1x64xf32>
    %39 = vector.extract_strided_slice %35 {offsets = [3, 0], sizes = [1, 32], strides = [1, 1]} : vector<8x96xf32> to vector<1x32xf32>
    %40 = vector.extract_strided_slice %35 {offsets = [4, 0], sizes = [1, 32], strides = [1, 1]} : vector<8x96xf32> to vector<1x32xf32>
    %41 = vector.extract_strided_slice %35 {offsets = [5, 0], sizes = [1, 32], strides = [1, 1]} : vector<8x96xf32> to vector<1x32xf32>
    %42 = vector.extract_strided_slice %35 {offsets = [6, 0], sizes = [1, 32], strides = [1, 1]} : vector<8x96xf32> to vector<1x32xf32>
    %43 = vector.extract_strided_slice %35 {offsets = [7, 0], sizes = [1, 32], strides = [1, 1]} : vector<8x96xf32> to vector<1x32xf32>
    %cst_25 = arith.constant dense<0.000000e+00> : vector<16x96xf32>
    %44 = tpu.matmul %25, %27, %cst_25 {dimension_numbers = #tpu.dot_dimension_numbers<[1], [0], [0], [1], [0, 0, 1, 1], [], []>} : vector<16x32xf32>, vector<32x96xf32>, vector<16x96xf32> -> vector<16x96xf32>
    %45 = vector.broadcast %36 : vector<1x96xf32> to vector<16x96xf32>
    %46 = arith.addf %44, %45 : vector<16x96xf32>
    %47 = vector.extract_strided_slice %46 {offsets = [0, 0], sizes = [16, 32], strides = [1, 1]} : vector<16x96xf32> to vector<16x32xf32>
    %cst_26 = arith.constant 0.353553385 : f32
    %48 = vector.broadcast %cst_26 : f32 to vector<16x32xf32>
    %49 = arith.mulf %47, %48 : vector<16x32xf32>
    %50 = vector.extract_strided_slice %46 {offsets = [0, 32], sizes = [16, 32], strides = [1, 1]} : vector<16x96xf32> to vector<16x32xf32>
    %51 = vector.extract_strided_slice %46 {offsets = [0, 64], sizes = [16, 32], strides = [1, 1]} : vector<16x96xf32> to vector<16x32xf32>
    %52 = vector.extract_strided_slice %49 {offsets = [0, 0], sizes = [16, 8], strides = [1, 1]} : vector<16x32xf32> to vector<16x8xf32>
    %53 = vector.extract_strided_slice %50 {offsets = [0, 0], sizes = [16, 8], strides = [1, 1]} : vector<16x32xf32> to vector<16x8xf32>
    %54 = vector.extract_strided_slice %51 {offsets = [0, 0], sizes = [16, 8], strides = [1, 1]} : vector<16x32xf32> to vector<16x8xf32>
    %55 = tpu.transpose %53, [1, 0] : vector<16x8xf32> -> vector<8x16xf32>
    %cst_27 = arith.constant dense<0.000000e+00> : vector<16x16xf32>
    %56 = tpu.matmul %52, %55, %cst_27 {dimension_numbers = #tpu.dot_dimension_numbers<[1], [0], [0], [1], [0, 0, 1, 1], [], []>} : vector<16x8xf32>, vector<8x16xf32>, vector<16x16xf32> -> vector<16x16xf32>
    %57 = arith.addf %56, %1 : vector<16x16xf32>
    %cst_28 = arith.constant dense<0xFF800000> : vector<16xf32>
    %58 = vector.multi_reduction <maximumf>, %57, %cst_28 [1] : vector<16x16xf32> to vector<16xf32>
    %59 = vector.shape_cast %58 : vector<16xf32> to vector<16x1xf32>
    %60 = vector.broadcast %59 : vector<16x1xf32> to vector<16x16xf32>
    %61 = arith.subf %57, %60 : vector<16x16xf32>
    %62 = math.exp %61 : vector<16x16xf32>
    %cst_29 = arith.constant dense<0.000000e+00> : vector<16xf32>
    %63 = vector.multi_reduction <add>, %62, %cst_29 [1] : vector<16x16xf32> to vector<16xf32>
    %64 = vector.shape_cast %63 : vector<16xf32> to vector<16x1xf32>
    %65 = tpu.reciprocal %64 {approx = true} : vector<16x1xf32> -> vector<16x1xf32>
    %66 = vector.broadcast %65 : vector<16x1xf32> to vector<16x16xf32>
    %67 = arith.mulf %62, %66 : vector<16x16xf32>
    %cst_30 = arith.constant dense<0.000000e+00> : vector<16x8xf32>
    %68 = tpu.matmul %67, %54, %cst_30 {dimension_numbers = #tpu.dot_dimension_numbers<[1], [0], [0], [1], [0, 0, 1, 1], [], []>} : vector<16x16xf32>, vector<16x8xf32>, vector<16x8xf32> -> vector<16x8xf32>
    %69 = vector.extract_strided_slice %49 {offsets = [0, 8], sizes = [16, 8], strides = [1, 1]} : vector<16x32xf32> to vector<16x8xf32>
    %70 = vector.extract_strided_slice %50 {offsets = [0, 8], sizes = [16, 8], strides = [1, 1]} : vector<16x32xf32> to vector<16x8xf32>
    %71 = vector.extract_strided_slice %51 {offsets = [0, 8], sizes = [16, 8], strides = [1, 1]} : vector<16x32xf32> to vector<16x8xf32>
    %72 = tpu.transpose %70, [1, 0] : vector<16x8xf32> -> vector<8x16xf32>
    %cst_31 = arith.constant dense<0.000000e+00> : vector<16x16xf32>
    %73 = tpu.matmul %69, %72, %cst_31 {dimension_numbers = #tpu.dot_dimension_numbers<[1], [0], [0], [1], [0, 0, 1, 1], [], []>} : vector<16x8xf32>, vector<8x16xf32>, vector<16x16xf32> -> vector<16x16xf32>
    %74 = arith.addf %73, %1 : vector<16x16xf32>
    %cst_32 = arith.constant dense<0xFF800000> : vector<16xf32>
    %75 = vector.multi_reduction <maximumf>, %74, %cst_32 [1] : vector<16x16xf32> to vector<16xf32>
    %76 = vector.shape_cast %75 : vector<16xf32> to vector<16x1xf32>
    %77 = vector.broadcast %76 : vector<16x1xf32> to vector<16x16xf32>
    %78 = arith.subf %74, %77 : vector<16x16xf32>
    %79 = math.exp %78 : vector<16x16xf32>
    %cst_33 = arith.constant dense<0.000000e+00> : vector<16xf32>
    %80 = vector.multi_reduction <add>, %79, %cst_33 [1] : vector<16x16xf32> to vector<16xf32>
    %81 = vector.shape_cast %80 : vector<16xf32> to vector<16x1xf32>
    %82 = tpu.reciprocal %81 {approx = true} : vector<16x1xf32> -> vector<16x1xf32>
    %83 = vector.broadcast %82 : vector<16x1xf32> to vector<16x16xf32>
    %84 = arith.mulf %79, %83 : vector<16x16xf32>
    %cst_34 = arith.constant dense<0.000000e+00> : vector<16x8xf32>
    %85 = tpu.matmul %84, %71, %cst_34 {dimension_numbers = #tpu.dot_dimension_numbers<[1], [0], [0], [1], [0, 0, 1, 1], [], []>} : vector<16x16xf32>, vector<16x8xf32>, vector<16x8xf32> -> vector<16x8xf32>
    %86 = vector.extract_strided_slice %49 {offsets = [0, 16], sizes = [16, 8], strides = [1, 1]} : vector<16x32xf32> to vector<16x8xf32>
    %87 = vector.extract_strided_slice %50 {offsets = [0, 16], sizes = [16, 8], strides = [1, 1]} : vector<16x32xf32> to vector<16x8xf32>
    %88 = vector.extract_strided_slice %51 {offsets = [0, 16], sizes = [16, 8], strides = [1, 1]} : vector<16x32xf32> to vector<16x8xf32>
    %89 = tpu.transpose %87, [1, 0] : vector<16x8xf32> -> vector<8x16xf32>
    %cst_35 = arith.constant dense<0.000000e+00> : vector<16x16xf32>
    %90 = tpu.matmul %86, %89, %cst_35 {dimension_numbers = #tpu.dot_dimension_numbers<[1], [0], [0], [1], [0, 0, 1, 1], [], []>} : vector<16x8xf32>, vector<8x16xf32>, vector<16x16xf32> -> vector<16x16xf32>
    %91 = arith.addf %90, %1 : vector<16x16xf32>
    %cst_36 = arith.constant dense<0xFF800000> : vector<16xf32>
    %92 = vector.multi_reduction <maximumf>, %91, %cst_36 [1] : vector<16x16xf32> to vector<16xf32>
    %93 = vector.shape_cast %92 : vector<16xf32> to vector<16x1xf32>
    %94 = vector.broadcast %93 : vector<16x1xf32> to vector<16x16xf32>
    %95 = arith.subf %91, %94 : vector<16x16xf32>
    %96 = math.exp %95 : vector<16x16xf32>
    %cst_37 = arith.constant dense<0.000000e+00> : vector<16xf32>
    %97 = vector.multi_reduction <add>, %96, %cst_37 [1] : vector<16x16xf32> to vector<16xf32>
    %98 = vector.shape_cast %97 : vector<16xf32> to vector<16x1xf32>
    %99 = tpu.reciprocal %98 {approx = true} : vector<16x1xf32> -> vector<16x1xf32>
    %100 = vector.broadcast %99 : vector<16x1xf32> to vector<16x16xf32>
    %101 = arith.mulf %96, %100 : vector<16x16xf32>
    %cst_38 = arith.constant dense<0.000000e+00> : vector<16x8xf32>
    %102 = tpu.matmul %101, %88, %cst_38 {dimension_numbers = #tpu.dot_dimension_numbers<[1], [0], [0], [1], [0, 0, 1, 1], [], []>} : vector<16x16xf32>, vector<16x8xf32>, vector<16x8xf32> -> vector<16x8xf32>
    %103 = vector.extract_strided_slice %49 {offsets = [0, 24], sizes = [16, 8], strides = [1, 1]} : vector<16x32xf32> to vector<16x8xf32>
    %104 = vector.extract_strided_slice %50 {offsets = [0, 24], sizes = [16, 8], strides = [1, 1]} : vector<16x32xf32> to vector<16x8xf32>
    %105 = vector.extract_strided_slice %51 {offsets = [0, 24], sizes = [16, 8], strides = [1, 1]} : vector<16x32xf32> to vector<16x8xf32>
    %106 = tpu.transpose %104, [1, 0] : vector<16x8xf32> -> vector<8x16xf32>
    %cst_39 = arith.constant dense<0.000000e+00> : vector<16x16xf32>
    %107 = tpu.matmul %103, %106, %cst_39 {dimension_numbers = #tpu.dot_dimension_numbers<[1], [0], [0], [1], [0, 0, 1, 1], [], []>} : vector<16x8xf32>, vector<8x16xf32>, vector<16x16xf32> -> vector<16x16xf32>
    %108 = arith.addf %107, %1 : vector<16x16xf32>
    %cst_40 = arith.constant dense<0xFF800000> : vector<16xf32>
    %109 = vector.multi_reduction <maximumf>, %108, %cst_40 [1] : vector<16x16xf32> to vector<16xf32>
    %110 = vector.shape_cast %109 : vector<16xf32> to vector<16x1xf32>
    %111 = vector.broadcast %110 : vector<16x1xf32> to vector<16x16xf32>
    %112 = arith.subf %108, %111 : vector<16x16xf32>
    %113 = math.exp %112 : vector<16x16xf32>
    %cst_41 = arith.constant dense<0.000000e+00> : vector<16xf32>
    %114 = vector.multi_reduction <add>, %113, %cst_41 [1] : vector<16x16xf32> to vector<16xf32>
    %115 = vector.shape_cast %114 : vector<16xf32> to vector<16x1xf32>
    %116 = tpu.reciprocal %115 {approx = true} : vector<16x1xf32> -> vector<16x1xf32>
    %117 = vector.broadcast %116 : vector<16x1xf32> to vector<16x16xf32>
    %118 = arith.mulf %113, %117 : vector<16x16xf32>
    %cst_42 = arith.constant dense<0.000000e+00> : vector<16x8xf32>
    %119 = tpu.matmul %118, %105, %cst_42 {dimension_numbers = #tpu.dot_dimension_numbers<[1], [0], [0], [1], [0, 0, 1, 1], [], []>} : vector<16x16xf32>, vector<16x8xf32>, vector<16x8xf32> -> vector<16x8xf32>
    %120 = tpu.concatenate %68, %85, %102, %119 in 1 : vector<16x8xf32>, vector<16x8xf32>, vector<16x8xf32>, vector<16x8xf32> -> vector<16x32xf32>
    %cst_43 = arith.constant dense<0.000000e+00> : vector<16x32xf32>
    %121 = tpu.matmul %120, %29, %cst_43 {dimension_numbers = #tpu.dot_dimension_numbers<[1], [0], [0], [1], [0, 0, 1, 1], [], []>} : vector<16x32xf32>, vector<32x32xf32>, vector<16x32xf32> -> vector<16x32xf32>
    %122 = vector.broadcast %37 : vector<1x32xf32> to vector<16x32xf32>
    %123 = arith.addf %121, %122 : vector<16x32xf32>
    %124 = arith.addf %25, %123 : vector<16x32xf32>
    %cst_44 = arith.constant dense<0.000000e+00> : vector<16xf32>
    %125 = vector.multi_reduction <add>, %124, %cst_44 [1] : vector<16x32xf32> to vector<16xf32>
    %126 = vector.shape_cast %125 : vector<16xf32> to vector<16x1xf32>
    %cst_45 = arith.constant 3.200000e+01 : f32
    %127 = vector.broadcast %cst_45 : f32 to vector<16x1xf32>
    %128 = arith.divf %126, %127 : vector<16x1xf32>
    %129 = vector.broadcast %128 : vector<16x1xf32> to vector<16x32xf32>
    %130 = arith.subf %124, %129 : vector<16x32xf32>
    %131 = arith.mulf %130, %130 : vector<16x32xf32>
    %cst_46 = arith.constant dense<0.000000e+00> : vector<16xf32>
    %132 = vector.multi_reduction <add>, %131, %cst_46 [1] : vector<16x32xf32> to vector<16xf32>
    %133 = vector.shape_cast %132 : vector<16xf32> to vector<16x1xf32>
    %cst_47 = arith.constant 3.200000e+01 : f32
    %134 = vector.broadcast %cst_47 : f32 to vector<16x1xf32>
    %135 = arith.divf %133, %134 : vector<16x1xf32>
    %136 = vector.broadcast %128 : vector<16x1xf32> to vector<16x32xf32>
    %137 = arith.subf %124, %136 : vector<16x32xf32>
    %cst_48 = arith.constant 9.99999974E-6 : f32
    %138 = vector.broadcast %cst_48 : f32 to vector<16x1xf32>
    %139 = arith.addf %135, %138 : vector<16x1xf32>
    %140 = math.rsqrt %139 : vector<16x1xf32>
    %141 = vector.broadcast %140 : vector<16x1xf32> to vector<16x32xf32>
    %142 = arith.mulf %137, %141 : vector<16x32xf32>
    %143 = vector.broadcast %40 : vector<1x32xf32> to vector<16x32xf32>
    %144 = arith.mulf %142, %143 : vector<16x32xf32>
    %145 = vector.broadcast %41 : vector<1x32xf32> to vector<16x32xf32>
    %146 = arith.addf %144, %145 : vector<16x32xf32>
    %cst_49 = arith.constant dense<0.000000e+00> : vector<16x64xf32>
    %147 = tpu.matmul %146, %31, %cst_49 {dimension_numbers = #tpu.dot_dimension_numbers<[1], [0], [0], [1], [0, 0, 1, 1], [], []>} : vector<16x32xf32>, vector<32x64xf32>, vector<16x64xf32> -> vector<16x64xf32>
    %148 = vector.broadcast %38 : vector<1x64xf32> to vector<16x64xf32>
    %149 = arith.addf %147, %148 : vector<16x64xf32>
    %cst_50 = arith.constant 5.000000e-01 : f32
    %150 = vector.broadcast %cst_50 : f32 to vector<16x64xf32>
    %151 = arith.mulf %150, %149 : vector<16x64xf32>
    %cst_51 = arith.constant 0.707106769 : f32
    %152 = vector.broadcast %cst_51 : f32 to vector<16x64xf32>
    %153 = arith.mulf %149, %152 : vector<16x64xf32>
    %154 = math.absf %153 : vector<16x64xf32>
    %cst_52 = arith.constant 0.327591091 : f32
    %155 = vector.broadcast %cst_52 : f32 to vector<16x64xf32>
    %156 = arith.mulf %155, %154 : vector<16x64xf32>
    %cst_53 = arith.constant 1.000000e+00 : f32
    %157 = vector.broadcast %cst_53 : f32 to vector<16x64xf32>
    %158 = arith.addf %157, %156 : vector<16x64xf32>
    %cst_54 = arith.constant 1.000000e+00 : f32
    %159 = vector.broadcast %cst_54 : f32 to vector<16x64xf32>
    %160 = arith.divf %159, %158 : vector<16x64xf32>
    %cst_55 = arith.constant 1.06140542 : f32
    %161 = vector.broadcast %cst_55 : f32 to vector<16x64xf32>
    %162 = arith.mulf %161, %160 : vector<16x64xf32>
    %cst_56 = arith.constant -1.45315206 : f32
    %163 = vector.broadcast %cst_56 : f32 to vector<16x64xf32>
    %164 = arith.addf %162, %163 : vector<16x64xf32>
    %165 = arith.mulf %164, %160 : vector<16x64xf32>
    %cst_57 = arith.constant 1.42141378 : f32
    %166 = vector.broadcast %cst_57 : f32 to vector<16x64xf32>
    %167 = arith.addf %165, %166 : vector<16x64xf32>
    %168 = arith.mulf %167, %160 : vector<16x64xf32>
    %cst_58 = arith.constant -0.284496725 : f32
    %169 = vector.broadcast %cst_58 : f32 to vector<16x64xf32>
    %170 = arith.addf %168, %169 : vector<16x64xf32>
    %171 = arith.mulf %170, %160 : vector<16x64xf32>
    %cst_59 = arith.constant 0.254829586 : f32
    %172 = vector.broadcast %cst_59 : f32 to vector<16x64xf32>
    %173 = arith.addf %171, %172 : vector<16x64xf32>
    %174 = arith.mulf %173, %160 : vector<16x64xf32>
    %cst_60 = arith.constant 0.000000e+00 : f32
    %175 = vector.broadcast %cst_60 : f32 to vector<16x64xf32>
    %176 = arith.subf %175, %154 : vector<16x64xf32>
    %177 = arith.mulf %176, %154 : vector<16x64xf32>
    %178 = math.exp %177 : vector<16x64xf32>
    %179 = arith.mulf %174, %178 : vector<16x64xf32>
    %cst_61 = arith.constant 1.000000e+00 : f32
    %180 = vector.broadcast %cst_61 : f32 to vector<16x64xf32>
    %181 = arith.subf %180, %179 : vector<16x64xf32>
    %cst_62 = arith.constant 0.000000e+00 : f32
    %182 = vector.broadcast %cst_62 : f32 to vector<16x64xf32>
    %183 = arith.cmpf oge, %153, %182 : vector<16x64xf32>
    %cst_63 = arith.constant 0.000000e+00 : f32
    %184 = vector.broadcast %cst_63 : f32 to vector<16x64xf32>
    %185 = arith.subf %184, %181 : vector<16x64xf32>
    %186 = arith.select %183, %181, %185 : vector<16x64xi1>, vector<16x64xf32>
    %cst_64 = arith.constant 1.000000e+00 : f32
    %187 = vector.broadcast %cst_64 : f32 to vector<16x64xf32>
    %188 = arith.addf %187, %186 : vector<16x64xf32>
    %189 = arith.mulf %151, %188 : vector<16x64xf32>
    %cst_65 = arith.constant dense<0.000000e+00> : vector<16x32xf32>
    %190 = tpu.matmul %189, %33, %cst_65 {dimension_numbers = #tpu.dot_dimension_numbers<[1], [0], [0], [1], [0, 0, 1, 1], [], []>} : vector<16x64xf32>, vector<64x32xf32>, vector<16x32xf32> -> vector<16x32xf32>
    %191 = vector.broadcast %39 : vector<1x32xf32> to vector<16x32xf32>
    %192 = arith.addf %190, %191 : vector<16x32xf32>
    %193 = arith.addf %146, %192 : vector<16x32xf32>
    %cst_66 = arith.constant dense<0.000000e+00> : vector<16xf32>
    %194 = vector.multi_reduction <add>, %193, %cst_66 [1] : vector<16x32xf32> to vector<16xf32>
    %195 = vector.shape_cast %194 : vector<16xf32> to vector<16x1xf32>
    %cst_67 = arith.constant 3.200000e+01 : f32
    %196 = vector.broadcast %cst_67 : f32 to vector<16x1xf32>
    %197 = arith.divf %195, %196 : vector<16x1xf32>
    %198 = vector.broadcast %197 : vector<16x1xf32> to vector<16x32xf32>
    %199 = arith.subf %193, %198 : vector<16x32xf32>
    %200 = arith.mulf %199, %199 : vector<16x32xf32>
    %cst_68 = arith.constant dense<0.000000e+00> : vector<16xf32>
    %201 = vector.multi_reduction <add>, %200, %cst_68 [1] : vector<16x32xf32> to vector<16xf32>
    %202 = vector.shape_cast %201 : vector<16xf32> to vector<16x1xf32>
    %cst_69 = arith.constant 3.200000e+01 : f32
    %203 = vector.broadcast %cst_69 : f32 to vector<16x1xf32>
    %204 = arith.divf %202, %203 : vector<16x1xf32>
    %205 = vector.broadcast %197 : vector<16x1xf32> to vector<16x32xf32>
    %206 = arith.subf %193, %205 : vector<16x32xf32>
    %cst_70 = arith.constant 9.99999974E-6 : f32
    %207 = vector.broadcast %cst_70 : f32 to vector<16x1xf32>
    %208 = arith.addf %204, %207 : vector<16x1xf32>
    %209 = math.rsqrt %208 : vector<16x1xf32>
    %210 = vector.broadcast %209 : vector<16x1xf32> to vector<16x32xf32>
    %211 = arith.mulf %206, %210 : vector<16x32xf32>
    %212 = vector.broadcast %42 : vector<1x32xf32> to vector<16x32xf32>
    %213 = arith.mulf %211, %212 : vector<16x32xf32>
    %214 = vector.broadcast %43 : vector<1x32xf32> to vector<16x32xf32>
    %215 = arith.addf %213, %214 : vector<16x32xf32>
    %216 = arith.cmpf one, %215, %215 : vector<16x32xf32>
    %217 = math.absf %215 : vector<16x32xf32>
    %cst_71 = arith.constant 0x7F800000 : f32
    %218 = vector.broadcast %cst_71 : f32 to vector<16x32xf32>
    %219 = arith.cmpf oeq, %217, %218 : vector<16x32xf32>
    %220 = arith.ori %216, %219 : vector<16x32xi1>
    %cst_72 = arith.constant 1.000000e+00 : f32
    %cst_73 = arith.constant 0.000000e+00 : f32
    %221 = vector.broadcast %cst_72 : f32 to vector<16x32xf32>
    %222 = vector.broadcast %cst_73 : f32 to vector<16x32xf32>
    %223 = arith.select %220, %221, %222 : vector<16x32xi1>, vector<16x32xf32>
    %224 = vector.shape_cast %223 : vector<16x32xf32> to vector<1x16x32xf32>
    %cst_74 = arith.constant dense<0xFF800000> : vector<1xf32>
    %225 = vector.multi_reduction <maximumf>, %224, %cst_74 [1, 2] : vector<1x16x32xf32> to vector<1xf32>
    %226 = vector.shape_cast %225 : vector<1xf32> to vector<1x1x1xf32>
    %227 = vector.extract %226[0, 0, 0] : f32 from vector<1x1x1xf32>
    %cst_75 = arith.constant 5.000000e-01 : f32
    %228 = arith.cmpf ogt, %227, %cst_75 : f32
    %cst_76 = arith.constant 0.000000e+00 : f32
    %cst_77 = arith.constant 3.40282347E+38 : f32
    %229 = arith.subf %cst_76, %cst_77 : f32
    %cst_78 = arith.constant 3.40282347E+38 : f32
    %230 = vector.broadcast %229 : f32 to vector<16x32xf32>
    %231 = arith.maximumf %230, %215 : vector<16x32xf32>
    %232 = vector.broadcast %cst_78 : f32 to vector<16x32xf32>
    %233 = arith.minimumf %232, %231 : vector<16x32xf32>
    %234 = arith.select %228, %233, %215 : vector<16x32xf32>
    %c1_79 = arith.constant 1 : index
    %c0_80 = arith.constant 0 : index
    %c0_81 = arith.constant 0 : index
    %235 = vector.load %arg4[%c1_79, %c0_80, %c0_81] : memref<2x32x96xf32, #tpu.memory_space<vmem>>, vector<1x32x96xf32>
    %236 = vector.shape_cast %235 : vector<1x32x96xf32> to vector<32x96xf32>
    %c1_82 = arith.constant 1 : index
    %c0_83 = arith.constant 0 : index
    %c0_84 = arith.constant 0 : index
    %237 = vector.load %arg5[%c1_82, %c0_83, %c0_84] : memref<2x32x32xf32, #tpu.memory_space<vmem>>, vector<1x32x32xf32>
    %238 = vector.shape_cast %237 : vector<1x32x32xf32> to vector<32x32xf32>
    %c1_85 = arith.constant 1 : index
    %c0_86 = arith.constant 0 : index
    %c0_87 = arith.constant 0 : index
    %239 = vector.load %arg6[%c1_85, %c0_86, %c0_87] : memref<2x32x64xf32, #tpu.memory_space<vmem>>, vector<1x32x64xf32>
    %240 = vector.shape_cast %239 : vector<1x32x64xf32> to vector<32x64xf32>
    %c1_88 = arith.constant 1 : index
    %c0_89 = arith.constant 0 : index
    %c0_90 = arith.constant 0 : index
    %241 = vector.load %arg7[%c1_88, %c0_89, %c0_90] : memref<2x64x32xf32, #tpu.memory_space<vmem>>, vector<1x64x32xf32>
    %242 = vector.shape_cast %241 : vector<1x64x32xf32> to vector<64x32xf32>
    %c1_91 = arith.constant 1 : index
    %c0_92 = arith.constant 0 : index
    %c0_93 = arith.constant 0 : index
    %243 = vector.load %arg8[%c1_91, %c0_92, %c0_93] : memref<2x8x96xf32, #tpu.memory_space<vmem>>, vector<1x8x96xf32>
    %244 = vector.shape_cast %243 : vector<1x8x96xf32> to vector<8x96xf32>
    %245 = vector.extract_strided_slice %244 {offsets = [0, 0], sizes = [1, 96], strides = [1, 1]} : vector<8x96xf32> to vector<1x96xf32>
    %246 = vector.extract_strided_slice %244 {offsets = [1, 0], sizes = [1, 32], strides = [1, 1]} : vector<8x96xf32> to vector<1x32xf32>
    %247 = vector.extract_strided_slice %244 {offsets = [2, 0], sizes = [1, 64], strides = [1, 1]} : vector<8x96xf32> to vector<1x64xf32>
    %248 = vector.extract_strided_slice %244 {offsets = [3, 0], sizes = [1, 32], strides = [1, 1]} : vector<8x96xf32> to vector<1x32xf32>
    %249 = vector.extract_strided_slice %244 {offsets = [4, 0], sizes = [1, 32], strides = [1, 1]} : vector<8x96xf32> to vector<1x32xf32>
    %250 = vector.extract_strided_slice %244 {offsets = [5, 0], sizes = [1, 32], strides = [1, 1]} : vector<8x96xf32> to vector<1x32xf32>
    %251 = vector.extract_strided_slice %244 {offsets = [6, 0], sizes = [1, 32], strides = [1, 1]} : vector<8x96xf32> to vector<1x32xf32>
    %252 = vector.extract_strided_slice %244 {offsets = [7, 0], sizes = [1, 32], strides = [1, 1]} : vector<8x96xf32> to vector<1x32xf32>
    %cst_94 = arith.constant dense<0.000000e+00> : vector<16x96xf32>
    %253 = tpu.matmul %234, %236, %cst_94 {dimension_numbers = #tpu.dot_dimension_numbers<[1], [0], [0], [1], [0, 0, 1, 1], [], []>} : vector<16x32xf32>, vector<32x96xf32>, vector<16x96xf32> -> vector<16x96xf32>
    %254 = vector.broadcast %245 : vector<1x96xf32> to vector<16x96xf32>
    %255 = arith.addf %253, %254 : vector<16x96xf32>
    %256 = vector.extract_strided_slice %255 {offsets = [0, 0], sizes = [16, 32], strides = [1, 1]} : vector<16x96xf32> to vector<16x32xf32>
    %cst_95 = arith.constant 0.353553385 : f32
    %257 = vector.broadcast %cst_95 : f32 to vector<16x32xf32>
    %258 = arith.mulf %256, %257 : vector<16x32xf32>
    %259 = vector.extract_strided_slice %255 {offsets = [0, 32], sizes = [16, 32], strides = [1, 1]} : vector<16x96xf32> to vector<16x32xf32>
    %260 = vector.extract_strided_slice %255 {offsets = [0, 64], sizes = [16, 32], strides = [1, 1]} : vector<16x96xf32> to vector<16x32xf32>
    %261 = vector.extract_strided_slice %258 {offsets = [0, 0], sizes = [16, 8], strides = [1, 1]} : vector<16x32xf32> to vector<16x8xf32>
    %262 = vector.extract_strided_slice %259 {offsets = [0, 0], sizes = [16, 8], strides = [1, 1]} : vector<16x32xf32> to vector<16x8xf32>
    %263 = vector.extract_strided_slice %260 {offsets = [0, 0], sizes = [16, 8], strides = [1, 1]} : vector<16x32xf32> to vector<16x8xf32>
    %264 = tpu.transpose %262, [1, 0] : vector<16x8xf32> -> vector<8x16xf32>
    %cst_96 = arith.constant dense<0.000000e+00> : vector<16x16xf32>
    %265 = tpu.matmul %261, %264, %cst_96 {dimension_numbers = #tpu.dot_dimension_numbers<[1], [0], [0], [1], [0, 0, 1, 1], [], []>} : vector<16x8xf32>, vector<8x16xf32>, vector<16x16xf32> -> vector<16x16xf32>
    %266 = arith.addf %265, %1 : vector<16x16xf32>
    %cst_97 = arith.constant dense<0xFF800000> : vector<16xf32>
    %267 = vector.multi_reduction <maximumf>, %266, %cst_97 [1] : vector<16x16xf32> to vector<16xf32>
    %268 = vector.shape_cast %267 : vector<16xf32> to vector<16x1xf32>
    %269 = vector.broadcast %268 : vector<16x1xf32> to vector<16x16xf32>
    %270 = arith.subf %266, %269 : vector<16x16xf32>
    %271 = math.exp %270 : vector<16x16xf32>
    %cst_98 = arith.constant dense<0.000000e+00> : vector<16xf32>
    %272 = vector.multi_reduction <add>, %271, %cst_98 [1] : vector<16x16xf32> to vector<16xf32>
    %273 = vector.shape_cast %272 : vector<16xf32> to vector<16x1xf32>
    %274 = tpu.reciprocal %273 {approx = true} : vector<16x1xf32> -> vector<16x1xf32>
    %275 = vector.broadcast %274 : vector<16x1xf32> to vector<16x16xf32>
    %276 = arith.mulf %271, %275 : vector<16x16xf32>
    %cst_99 = arith.constant dense<0.000000e+00> : vector<16x8xf32>
    %277 = tpu.matmul %276, %263, %cst_99 {dimension_numbers = #tpu.dot_dimension_numbers<[1], [0], [0], [1], [0, 0, 1, 1], [], []>} : vector<16x16xf32>, vector<16x8xf32>, vector<16x8xf32> -> vector<16x8xf32>
    %278 = vector.extract_strided_slice %258 {offsets = [0, 8], sizes = [16, 8], strides = [1, 1]} : vector<16x32xf32> to vector<16x8xf32>
    %279 = vector.extract_strided_slice %259 {offsets = [0, 8], sizes = [16, 8], strides = [1, 1]} : vector<16x32xf32> to vector<16x8xf32>
    %280 = vector.extract_strided_slice %260 {offsets = [0, 8], sizes = [16, 8], strides = [1, 1]} : vector<16x32xf32> to vector<16x8xf32>
    %281 = tpu.transpose %279, [1, 0] : vector<16x8xf32> -> vector<8x16xf32>
    %cst_100 = arith.constant dense<0.000000e+00> : vector<16x16xf32>
    %282 = tpu.matmul %278, %281, %cst_100 {dimension_numbers = #tpu.dot_dimension_numbers<[1], [0], [0], [1], [0, 0, 1, 1], [], []>} : vector<16x8xf32>, vector<8x16xf32>, vector<16x16xf32> -> vector<16x16xf32>
    %283 = arith.addf %282, %1 : vector<16x16xf32>
    %cst_101 = arith.constant dense<0xFF800000> : vector<16xf32>
    %284 = vector.multi_reduction <maximumf>, %283, %cst_101 [1] : vector<16x16xf32> to vector<16xf32>
    %285 = vector.shape_cast %284 : vector<16xf32> to vector<16x1xf32>
    %286 = vector.broadcast %285 : vector<16x1xf32> to vector<16x16xf32>
    %287 = arith.subf %283, %286 : vector<16x16xf32>
    %288 = math.exp %287 : vector<16x16xf32>
    %cst_102 = arith.constant dense<0.000000e+00> : vector<16xf32>
    %289 = vector.multi_reduction <add>, %288, %cst_102 [1] : vector<16x16xf32> to vector<16xf32>
    %290 = vector.shape_cast %289 : vector<16xf32> to vector<16x1xf32>
    %291 = tpu.reciprocal %290 {approx = true} : vector<16x1xf32> -> vector<16x1xf32>
    %292 = vector.broadcast %291 : vector<16x1xf32> to vector<16x16xf32>
    %293 = arith.mulf %288, %292 : vector<16x16xf32>
    %cst_103 = arith.constant dense<0.000000e+00> : vector<16x8xf32>
    %294 = tpu.matmul %293, %280, %cst_103 {dimension_numbers = #tpu.dot_dimension_numbers<[1], [0], [0], [1], [0, 0, 1, 1], [], []>} : vector<16x16xf32>, vector<16x8xf32>, vector<16x8xf32> -> vector<16x8xf32>
    %295 = vector.extract_strided_slice %258 {offsets = [0, 16], sizes = [16, 8], strides = [1, 1]} : vector<16x32xf32> to vector<16x8xf32>
    %296 = vector.extract_strided_slice %259 {offsets = [0, 16], sizes = [16, 8], strides = [1, 1]} : vector<16x32xf32> to vector<16x8xf32>
    %297 = vector.extract_strided_slice %260 {offsets = [0, 16], sizes = [16, 8], strides = [1, 1]} : vector<16x32xf32> to vector<16x8xf32>
    %298 = tpu.transpose %296, [1, 0] : vector<16x8xf32> -> vector<8x16xf32>
    %cst_104 = arith.constant dense<0.000000e+00> : vector<16x16xf32>
    %299 = tpu.matmul %295, %298, %cst_104 {dimension_numbers = #tpu.dot_dimension_numbers<[1], [0], [0], [1], [0, 0, 1, 1], [], []>} : vector<16x8xf32>, vector<8x16xf32>, vector<16x16xf32> -> vector<16x16xf32>
    %300 = arith.addf %299, %1 : vector<16x16xf32>
    %cst_105 = arith.constant dense<0xFF800000> : vector<16xf32>
    %301 = vector.multi_reduction <maximumf>, %300, %cst_105 [1] : vector<16x16xf32> to vector<16xf32>
    %302 = vector.shape_cast %301 : vector<16xf32> to vector<16x1xf32>
    %303 = vector.broadcast %302 : vector<16x1xf32> to vector<16x16xf32>
    %304 = arith.subf %300, %303 : vector<16x16xf32>
    %305 = math.exp %304 : vector<16x16xf32>
    %cst_106 = arith.constant dense<0.000000e+00> : vector<16xf32>
    %306 = vector.multi_reduction <add>, %305, %cst_106 [1] : vector<16x16xf32> to vector<16xf32>
    %307 = vector.shape_cast %306 : vector<16xf32> to vector<16x1xf32>
    %308 = tpu.reciprocal %307 {approx = true} : vector<16x1xf32> -> vector<16x1xf32>
    %309 = vector.broadcast %308 : vector<16x1xf32> to vector<16x16xf32>
    %310 = arith.mulf %305, %309 : vector<16x16xf32>
    %cst_107 = arith.constant dense<0.000000e+00> : vector<16x8xf32>
    %311 = tpu.matmul %310, %297, %cst_107 {dimension_numbers = #tpu.dot_dimension_numbers<[1], [0], [0], [1], [0, 0, 1, 1], [], []>} : vector<16x16xf32>, vector<16x8xf32>, vector<16x8xf32> -> vector<16x8xf32>
    %312 = vector.extract_strided_slice %258 {offsets = [0, 24], sizes = [16, 8], strides = [1, 1]} : vector<16x32xf32> to vector<16x8xf32>
    %313 = vector.extract_strided_slice %259 {offsets = [0, 24], sizes = [16, 8], strides = [1, 1]} : vector<16x32xf32> to vector<16x8xf32>
    %314 = vector.extract_strided_slice %260 {offsets = [0, 24], sizes = [16, 8], strides = [1, 1]} : vector<16x32xf32> to vector<16x8xf32>
    %315 = tpu.transpose %313, [1, 0] : vector<16x8xf32> -> vector<8x16xf32>
    %cst_108 = arith.constant dense<0.000000e+00> : vector<16x16xf32>
    %316 = tpu.matmul %312, %315, %cst_108 {dimension_numbers = #tpu.dot_dimension_numbers<[1], [0], [0], [1], [0, 0, 1, 1], [], []>} : vector<16x8xf32>, vector<8x16xf32>, vector<16x16xf32> -> vector<16x16xf32>
    %317 = arith.addf %316, %1 : vector<16x16xf32>
    %cst_109 = arith.constant dense<0xFF800000> : vector<16xf32>
    %318 = vector.multi_reduction <maximumf>, %317, %cst_109 [1] : vector<16x16xf32> to vector<16xf32>
    %319 = vector.shape_cast %318 : vector<16xf32> to vector<16x1xf32>
    %320 = vector.broadcast %319 : vector<16x1xf32> to vector<16x16xf32>
    %321 = arith.subf %317, %320 : vector<16x16xf32>
    %322 = math.exp %321 : vector<16x16xf32>
    %cst_110 = arith.constant dense<0.000000e+00> : vector<16xf32>
    %323 = vector.multi_reduction <add>, %322, %cst_110 [1] : vector<16x16xf32> to vector<16xf32>
    %324 = vector.shape_cast %323 : vector<16xf32> to vector<16x1xf32>
    %325 = tpu.reciprocal %324 {approx = true} : vector<16x1xf32> -> vector<16x1xf32>
    %326 = vector.broadcast %325 : vector<16x1xf32> to vector<16x16xf32>
    %327 = arith.mulf %322, %326 : vector<16x16xf32>
    %cst_111 = arith.constant dense<0.000000e+00> : vector<16x8xf32>
    %328 = tpu.matmul %327, %314, %cst_111 {dimension_numbers = #tpu.dot_dimension_numbers<[1], [0], [0], [1], [0, 0, 1, 1], [], []>} : vector<16x16xf32>, vector<16x8xf32>, vector<16x8xf32> -> vector<16x8xf32>
    %329 = tpu.concatenate %277, %294, %311, %328 in 1 : vector<16x8xf32>, vector<16x8xf32>, vector<16x8xf32>, vector<16x8xf32> -> vector<16x32xf32>
    %cst_112 = arith.constant dense<0.000000e+00> : vector<16x32xf32>
    %330 = tpu.matmul %329, %238, %cst_112 {dimension_numbers = #tpu.dot_dimension_numbers<[1], [0], [0], [1], [0, 0, 1, 1], [], []>} : vector<16x32xf32>, vector<32x32xf32>, vector<16x32xf32> -> vector<16x32xf32>
    %331 = vector.broadcast %246 : vector<1x32xf32> to vector<16x32xf32>
    %332 = arith.addf %330, %331 : vector<16x32xf32>
    %333 = arith.addf %234, %332 : vector<16x32xf32>
    %cst_113 = arith.constant dense<0.000000e+00> : vector<16xf32>
    %334 = vector.multi_reduction <add>, %333, %cst_113 [1] : vector<16x32xf32> to vector<16xf32>
    %335 = vector.shape_cast %334 : vector<16xf32> to vector<16x1xf32>
    %cst_114 = arith.constant 3.200000e+01 : f32
    %336 = vector.broadcast %cst_114 : f32 to vector<16x1xf32>
    %337 = arith.divf %335, %336 : vector<16x1xf32>
    %338 = vector.broadcast %337 : vector<16x1xf32> to vector<16x32xf32>
    %339 = arith.subf %333, %338 : vector<16x32xf32>
    %340 = arith.mulf %339, %339 : vector<16x32xf32>
    %cst_115 = arith.constant dense<0.000000e+00> : vector<16xf32>
    %341 = vector.multi_reduction <add>, %340, %cst_115 [1] : vector<16x32xf32> to vector<16xf32>
    %342 = vector.shape_cast %341 : vector<16xf32> to vector<16x1xf32>
    %cst_116 = arith.constant 3.200000e+01 : f32
    %343 = vector.broadcast %cst_116 : f32 to vector<16x1xf32>
    %344 = arith.divf %342, %343 : vector<16x1xf32>
    %345 = vector.broadcast %337 : vector<16x1xf32> to vector<16x32xf32>
    %346 = arith.subf %333, %345 : vector<16x32xf32>
    %cst_117 = arith.constant 9.99999974E-6 : f32
    %347 = vector.broadcast %cst_117 : f32 to vector<16x1xf32>
    %348 = arith.addf %344, %347 : vector<16x1xf32>
    %349 = math.rsqrt %348 : vector<16x1xf32>
    %350 = vector.broadcast %349 : vector<16x1xf32> to vector<16x32xf32>
    %351 = arith.mulf %346, %350 : vector<16x32xf32>
    %352 = vector.broadcast %249 : vector<1x32xf32> to vector<16x32xf32>
    %353 = arith.mulf %351, %352 : vector<16x32xf32>
    %354 = vector.broadcast %250 : vector<1x32xf32> to vector<16x32xf32>
    %355 = arith.addf %353, %354 : vector<16x32xf32>
    %cst_118 = arith.constant dense<0.000000e+00> : vector<16x64xf32>
    %356 = tpu.matmul %355, %240, %cst_118 {dimension_numbers = #tpu.dot_dimension_numbers<[1], [0], [0], [1], [0, 0, 1, 1], [], []>} : vector<16x32xf32>, vector<32x64xf32>, vector<16x64xf32> -> vector<16x64xf32>
    %357 = vector.broadcast %247 : vector<1x64xf32> to vector<16x64xf32>
    %358 = arith.addf %356, %357 : vector<16x64xf32>
    %cst_119 = arith.constant 5.000000e-01 : f32
    %359 = vector.broadcast %cst_119 : f32 to vector<16x64xf32>
    %360 = arith.mulf %359, %358 : vector<16x64xf32>
    %cst_120 = arith.constant 0.707106769 : f32
    %361 = vector.broadcast %cst_120 : f32 to vector<16x64xf32>
    %362 = arith.mulf %358, %361 : vector<16x64xf32>
    %363 = math.absf %362 : vector<16x64xf32>
    %cst_121 = arith.constant 0.327591091 : f32
    %364 = vector.broadcast %cst_121 : f32 to vector<16x64xf32>
    %365 = arith.mulf %364, %363 : vector<16x64xf32>
    %cst_122 = arith.constant 1.000000e+00 : f32
    %366 = vector.broadcast %cst_122 : f32 to vector<16x64xf32>
    %367 = arith.addf %366, %365 : vector<16x64xf32>
    %cst_123 = arith.constant 1.000000e+00 : f32
    %368 = vector.broadcast %cst_123 : f32 to vector<16x64xf32>
    %369 = arith.divf %368, %367 : vector<16x64xf32>
    %cst_124 = arith.constant 1.06140542 : f32
    %370 = vector.broadcast %cst_124 : f32 to vector<16x64xf32>
    %371 = arith.mulf %370, %369 : vector<16x64xf32>
    %cst_125 = arith.constant -1.45315206 : f32
    %372 = vector.broadcast %cst_125 : f32 to vector<16x64xf32>
    %373 = arith.addf %371, %372 : vector<16x64xf32>
    %374 = arith.mulf %373, %369 : vector<16x64xf32>
    %cst_126 = arith.constant 1.42141378 : f32
    %375 = vector.broadcast %cst_126 : f32 to vector<16x64xf32>
    %376 = arith.addf %374, %375 : vector<16x64xf32>
    %377 = arith.mulf %376, %369 : vector<16x64xf32>
    %cst_127 = arith.constant -0.284496725 : f32
    %378 = vector.broadcast %cst_127 : f32 to vector<16x64xf32>
    %379 = arith.addf %377, %378 : vector<16x64xf32>
    %380 = arith.mulf %379, %369 : vector<16x64xf32>
    %cst_128 = arith.constant 0.254829586 : f32
    %381 = vector.broadcast %cst_128 : f32 to vector<16x64xf32>
    %382 = arith.addf %380, %381 : vector<16x64xf32>
    %383 = arith.mulf %382, %369 : vector<16x64xf32>
    %cst_129 = arith.constant 0.000000e+00 : f32
    %384 = vector.broadcast %cst_129 : f32 to vector<16x64xf32>
    %385 = arith.subf %384, %363 : vector<16x64xf32>
    %386 = arith.mulf %385, %363 : vector<16x64xf32>
    %387 = math.exp %386 : vector<16x64xf32>
    %388 = arith.mulf %383, %387 : vector<16x64xf32>
    %cst_130 = arith.constant 1.000000e+00 : f32
    %389 = vector.broadcast %cst_130 : f32 to vector<16x64xf32>
    %390 = arith.subf %389, %388 : vector<16x64xf32>
    %cst_131 = arith.constant 0.000000e+00 : f32
    %391 = vector.broadcast %cst_131 : f32 to vector<16x64xf32>
    %392 = arith.cmpf oge, %362, %391 : vector<16x64xf32>
    %cst_132 = arith.constant 0.000000e+00 : f32
    %393 = vector.broadcast %cst_132 : f32 to vector<16x64xf32>
    %394 = arith.subf %393, %390 : vector<16x64xf32>
    %395 = arith.select %392, %390, %394 : vector<16x64xi1>, vector<16x64xf32>
    %cst_133 = arith.constant 1.000000e+00 : f32
    %396 = vector.broadcast %cst_133 : f32 to vector<16x64xf32>
    %397 = arith.addf %396, %395 : vector<16x64xf32>
    %398 = arith.mulf %360, %397 : vector<16x64xf32>
    %cst_134 = arith.constant dense<0.000000e+00> : vector<16x32xf32>
    %399 = tpu.matmul %398, %242, %cst_134 {dimension_numbers = #tpu.dot_dimension_numbers<[1], [0], [0], [1], [0, 0, 1, 1], [], []>} : vector<16x64xf32>, vector<64x32xf32>, vector<16x32xf32> -> vector<16x32xf32>
    %400 = vector.broadcast %248 : vector<1x32xf32> to vector<16x32xf32>
    %401 = arith.addf %399, %400 : vector<16x32xf32>
    %402 = arith.addf %355, %401 : vector<16x32xf32>
    %cst_135 = arith.constant dense<0.000000e+00> : vector<16xf32>
    %403 = vector.multi_reduction <add>, %402, %cst_135 [1] : vector<16x32xf32> to vector<16xf32>
    %404 = vector.shape_cast %403 : vector<16xf32> to vector<16x1xf32>
    %cst_136 = arith.constant 3.200000e+01 : f32
    %405 = vector.broadcast %cst_136 : f32 to vector<16x1xf32>
    %406 = arith.divf %404, %405 : vector<16x1xf32>
    %407 = vector.broadcast %406 : vector<16x1xf32> to vector<16x32xf32>
    %408 = arith.subf %402, %407 : vector<16x32xf32>
    %409 = arith.mulf %408, %408 : vector<16x32xf32>
    %cst_137 = arith.constant dense<0.000000e+00> : vector<16xf32>
    %410 = vector.multi_reduction <add>, %409, %cst_137 [1] : vector<16x32xf32> to vector<16xf32>
    %411 = vector.shape_cast %410 : vector<16xf32> to vector<16x1xf32>
    %cst_138 = arith.constant 3.200000e+01 : f32
    %412 = vector.broadcast %cst_138 : f32 to vector<16x1xf32>
    %413 = arith.divf %411, %412 : vector<16x1xf32>
    %414 = vector.broadcast %406 : vector<16x1xf32> to vector<16x32xf32>
    %415 = arith.subf %402, %414 : vector<16x32xf32>
    %cst_139 = arith.constant 9.99999974E-6 : f32
    %416 = vector.broadcast %cst_139 : f32 to vector<16x1xf32>
    %417 = arith.addf %413, %416 : vector<16x1xf32>
    %418 = math.rsqrt %417 : vector<16x1xf32>
    %419 = vector.broadcast %418 : vector<16x1xf32> to vector<16x32xf32>
    %420 = arith.mulf %415, %419 : vector<16x32xf32>
    %421 = vector.broadcast %251 : vector<1x32xf32> to vector<16x32xf32>
    %422 = arith.mulf %420, %421 : vector<16x32xf32>
    %423 = vector.broadcast %252 : vector<1x32xf32> to vector<16x32xf32>
    %424 = arith.addf %422, %423 : vector<16x32xf32>
    %425 = arith.cmpf one, %424, %424 : vector<16x32xf32>
    %426 = math.absf %424 : vector<16x32xf32>
    %cst_140 = arith.constant 0x7F800000 : f32
    %427 = vector.broadcast %cst_140 : f32 to vector<16x32xf32>
    %428 = arith.cmpf oeq, %426, %427 : vector<16x32xf32>
    %429 = arith.ori %425, %428 : vector<16x32xi1>
    %cst_141 = arith.constant 1.000000e+00 : f32
    %cst_142 = arith.constant 0.000000e+00 : f32
    %430 = vector.broadcast %cst_141 : f32 to vector<16x32xf32>
    %431 = vector.broadcast %cst_142 : f32 to vector<16x32xf32>
    %432 = arith.select %429, %430, %431 : vector<16x32xi1>, vector<16x32xf32>
    %433 = vector.shape_cast %432 : vector<16x32xf32> to vector<1x16x32xf32>
    %cst_143 = arith.constant dense<0xFF800000> : vector<1xf32>
    %434 = vector.multi_reduction <maximumf>, %433, %cst_143 [1, 2] : vector<1x16x32xf32> to vector<1xf32>
    %435 = vector.shape_cast %434 : vector<1xf32> to vector<1x1x1xf32>
    %436 = vector.extract %435[0, 0, 0] : f32 from vector<1x1x1xf32>
    %cst_144 = arith.constant 5.000000e-01 : f32
    %437 = arith.cmpf ogt, %436, %cst_144 : f32
    %cst_145 = arith.constant 0.000000e+00 : f32
    %cst_146 = arith.constant 3.40282347E+38 : f32
    %438 = arith.subf %cst_145, %cst_146 : f32
    %cst_147 = arith.constant 3.40282347E+38 : f32
    %439 = vector.broadcast %438 : f32 to vector<16x32xf32>
    %440 = arith.maximumf %439, %424 : vector<16x32xf32>
    %441 = vector.broadcast %cst_147 : f32 to vector<16x32xf32>
    %442 = arith.minimumf %441, %440 : vector<16x32xf32>
    %443 = arith.select %437, %442, %424 : vector<16x32xf32>
    %c0_148 = arith.constant 0 : index
    %c0_149 = arith.constant 0 : index
    %444 = vector.load %arg9[%c0_148, %c0_149] : memref<16x32xf32, #tpu.memory_space<vmem>>, vector<16x32xf32>
    tpu.vector_store %arg9[%c0_148, %c0_149], %443 {strides = array<i32>} : memref<16x32xf32, #tpu.memory_space<vmem>>, vector<16x32xf32>,
    return
  }
  func.func @transform_0(%arg0: i32) -> (i32, i32) {
    %c0_i32 = arith.constant 0 : i32
    %c0_i32_0 = arith.constant 0 : i32
    %c0_i32_1 = arith.constant 0 : i32
    return %c0_i32, %c0_i32_0 : i32, i32
  }
  func.func @transform_1(%arg0: i32) -> (i32, i32) {
    %c0_i32 = arith.constant 0 : i32
    %c0_i32_0 = arith.constant 0 : i32
    %c0_i32_1 = arith.constant 0 : i32
    return %c0_i32, %c0_i32_0 : i32, i32
  }
  func.func @transform_2(%arg0: i32) -> (i32, i32) {
    %c0_i32 = arith.constant 0 : i32
    %c0_i32_0 = arith.constant 0 : i32
    %c0_i32_1 = arith.constant 0 : i32
    return %c0_i32, %c0_i32_0 : i32, i32
  }
  func.func @transform_3(%arg0: i32) -> (i32, i32, i32) {
    %c0_i32 = arith.constant 0 : i32
    %c0_i32_0 = arith.constant 0 : i32
    %c0_i32_1 = arith.constant 0 : i32
    %c0_i32_2 = arith.constant 0 : i32
    return %c0_i32, %c0_i32_0, %c0_i32_1 : i32, i32, i32
  }
  func.func @transform_4(%arg0: i32) -> (i32, i32, i32) {
    %c0_i32 = arith.constant 0 : i32
    %c0_i32_0 = arith.constant 0 : i32
    %c0_i32_1 = arith.constant 0 : i32
    %c0_i32_2 = arith.constant 0 : i32
    return %c0_i32, %c0_i32_0, %c0_i32_1 : i32, i32, i32
  }
  func.func @transform_5(%arg0: i32) -> (i32, i32, i32) {
    %c0_i32 = arith.constant 0 : i32
    %c0_i32_0 = arith.constant 0 : i32
    %c0_i32_1 = arith.constant 0 : i32
    %c0_i32_2 = arith.constant 0 : i32
    return %c0_i32, %c0_i32_0, %c0_i32_1 : i32, i32, i32
  }
  func.func @transform_6(%arg0: i32) -> (i32, i32, i32) {
    %c0_i32 = arith.constant 0 : i32
    %c0_i32_0 = arith.constant 0 : i32
    %c0_i32_1 = arith.constant 0 : i32
    %c0_i32_2 = arith.constant 0 : i32
    return %c0_i32, %c0_i32_0, %c0_i32_1 : i32, i32, i32
  }
  func.func @transform_7(%arg0: i32) -> (i32, i32, i32) {
    %c0_i32 = arith.constant 0 : i32
    %c0_i32_0 = arith.constant 0 : i32
    %c0_i32_1 = arith.constant 0 : i32
    %c0_i32_2 = arith.constant 0 : i32
    return %c0_i32, %c0_i32_0, %c0_i32_1 : i32, i32, i32
  }
  func.func @transform_8(%arg0: i32) -> (i32, i32) {
    %c0_i32 = arith.constant 0 : i32
    %c0_i32_0 = arith.constant 0 : i32
    %c0_i32_1 = arith.constant 0 : i32
    return %c0_i32, %c0_i32_0 : i32, i32
  }
}

</mosaic_0001>

<bundles_post_ra>
// kernel: tpu_custom_call.1
= control target key start
LH: loop header
LB: loop body
LE: loop exit
PB: predicated region body
PF: predicated region fallthrough
CT: control target
= control target key end

     0   :  { %13 = vsyncpa [#allocation3], 0  ;;  %s2647_s0 = inlined_call_operand.hbm [shape: f32[16,32], index: 0, kind: input, shape index: {}]   ;;  %s2648_s1 = inlined_call_operand.hbm [shape: f32[16,16], index: 1, kind: input, shape index: {}]   ;;  %s2649_s2 = inlined_call_operand.hbm [shape: f32[2,32], index: 2, kind: input, shape index: {}]   ;;  %s2650_s3 = inlined_call_operand.vmem [shape: f32[2,32,96], index: 3, kind: input, shape index: {}]   ;;  %s2651_s4 = inlined_call_operand.vmem [shape: f32[2,32,32], index: 4, kind: input, shape index: {}]   ;;  %s2652_s5 = inlined_call_operand.vmem [shape: f32[2,32,64], index: 5, kind: input, shape index: {}]   ;;  %s2653_s6 = inlined_call_operand.vmem [shape: f32[2,64,32], index: 6, kind: input, shape index: {}]   ;;  %s2654_s7 = inlined_call_operand.hbm [shape: f32[2,8,96], index: 7, kind: input, shape index: {}]   ;;  %s2655_s8 = inlined_call_operand.hbm [shape: f32[16,32], index: 8, kind: output, shape index: {}]  }
   0x1   :  { %14 = vsyncpa [#allocation6], 0 }
   0x2   :  { %15 = vsyncpa [#allocation9], 0 }
   0x3   :  { %16 = vsyncpa [#allocation4], 0  ;;  %s34_s29 = sshll.u32 %s2648_s1, 4  ;;  %s2121_s30 = smov [#allocation5]   ;;  %s35_s29 = int_to_ptr.hbm [resolvable:$true] %s34_s29 }
   0x4   :  { %s36_s9 = sshll.u32 %s2121_s30, 4  ;;  %s21_s12 = sshll.u32 %s2647_s0, 4  ;;  %s37_s9 = int_to_ptr.vmem [resolvable:$true] %s36_s9  ;;  %s22_s12 = int_to_ptr.hbm [resolvable:$true] %s21_s12 }
   0x5   :  { %s2122_s13 = smov 128   ;;  %s2123_s14 = smov 8  }
   0x6   :  { %42 = dma.hbm_to_vmem [thread:$0]  %s35_s29, 256, %s37_s9, [#allocation6], %s2122_s13, %s2122_s13, %s2123_s14  }
   0x7   :  { %s2124_s15 = smov [#allocation2]   ;;  %s48_s1 = sshll.u32 %s2649_s2, 4  ;;  %s49_s1 = int_to_ptr.hbm [resolvable:$true] %s48_s1 }
   0x8   :  { %s23_s16 = sshll.u32 %s2124_s15, 4  ;;  %s66_s20 = sshll.u32 %s2654_s7, 4  ;;  %s24_s16 = int_to_ptr.vmem [resolvable:$true] %s23_s16  ;;  %s67_s20 = int_to_ptr.hbm [resolvable:$true] %s66_s20 }
   0x9   :  { %29 = dma.hbm_to_vmem [thread:$0]  %s22_s12, 256, %s24_s16, [#allocation3], %s2122_s13, %s2122_s13, %s2123_s14  }
   0xa   :  { %s2125_s21 = smov [#allocation7]   ;;  %s2126_s23 = smov [#allocation8]  }
   0xb   :  { %s50_s22 = sshll.u32 %s2125_s21, 4  ;;  %s68_s24 = sshll.u32 %s2126_s23, 4  ;;  %s51_s22 = int_to_ptr.vmem [resolvable:$true] %s50_s22  ;;  %s69_s24 = int_to_ptr.vmem [resolvable:$true] %s68_s24 }
   0xc   :  { %53 = dma.hbm_to_vmem [thread:$0]  %s49_s1, 32, %s51_s22, [#allocation6]  }
   0xd   :  { %74 = dma.hbm_to_vmem [thread:$0]  %s67_s20, 256, %s69_s24, [#allocation9], %s2122_s13, %s2122_s13, %s2123_s14  }
   0xe   :  { %2113 = dma.done.wait [#allocation3], 256  }
   0xf   :  { %2114 = vsyncadd [#allocation3], 4294967040 }
  0x10   :  { %2115 = dma.done.wait [#allocation6], 288  }
  0x11   :  { %2116 = vsyncadd [#allocation6], 4294967008 }
  0x12   :  { %2117 = dma.done.wait [#allocation9], 256  }
  0x13   :  { %2118 = vsyncadd [#allocation9], 4294967040  ;;  %vm97_vm0 = vcmask 261120   ;;  %v91_v0 = vld [vmem:[#allocation2] sm:$0xff]  ;;  %v92_v2 = vld [vmem:[#allocation2 + $0x8] sm:$0xff]  ;;  %v2127_v4 = vmov 32.0  }
  0x14   :  { %v98_v1 = vsel %vm97_vm0, %v91_v0, 0.0  ;;  %v101_v3 = vsel %vm97_vm0, %v92_v2, 0.0  ;;  %1889 = vrcp.f32 %v2127_v4  ;;  %v158_v21 = vld [vmem:[%s2650_s3 + $0x18] sm:$0xff]  ;;  %v157_v22 = vld [vmem:[%s2650_s3 + $0x10] sm:$0xff]  ;;  %v156_v23 = vld [vmem:[%s2650_s3 + $0x8] sm:$0xff]  ;;  %s2128_s9 = smov 88  }
  0x15   :  { %99 = vadd.xlane.f32.xlu0 %v98_v1  ;;  %195 = vmatpush.msra.mxu0 %v158_v21  ;;  %v155_v24 = vld [vmem:[%s2650_s3] sm:$0xff]  ;;  %s2129_s10 = smov 80   ;;  %s2130_s11 = smov 96   ;;  %vm214_vm8 = vcmask 64512   ;;  %vm248_vm9 = vcmask 130048   ;;  %vm622_vm10 = vcmask 195584  }
  0x16   :  { %v1887_v39 = vld [vmem:[#allocation7] ss:$0 sm:$0xff]  ;;  %v1888_v43 = vld [vmem:[#allocation7 + $0x1] ss:$0 sm:$0xff]  ;;  %v2239_v53 = vld [vmem:[#allocation8] sm:$0xff]  ;;  %s2131_s12 = smov 112  }
  0x17   :  { %196 = vmatpush.msra.mxu0 %v157_v22  ;;  %v176_v54 = vperm.slane %v2239_v53, 0  ;;  %s2132_s15 = smov 72   ;;  %s2133_s16 = smov 120  }
  0x18   :  { %s2134_s17 = smov 104   ;;  %s2135_s18 = smov 64  }
  0x19   :  { %197 = vmatpush.msra.mxu0 %v156_v23  ;;  %s2136_s1 = smov 56   ;;  %s2137_s0 = smov 40  }
  0x1a   :  { %v1890_v5 = vpop.eup %1889  ;;  %s2138_s19 = smov 48   ;;  %s2139_s20 = smov 24  }
  0x1b   :  { %v105_v6 = vmul.f32 32.0, %v1890_v5  ;;  %vm109_vm1 = vweird.f32 %v1890_v5  ;;  %198 = vmatpush.msra.mxu0 %v155_v24  ;;  %s2140_s21 = smov 16  }
  0x1d   :  { %102 = vadd.xlane.f32.xlu0 %v101_v3  ;;  %v106_v7 = vsub.f32 1.0, %v105_v6 }
  0x1f   :  { %v107_v8 = vmul.f32 %v1890_v5, %v106_v7 }
  0x21   :  { %v108_v9 = vadd.f32 %v1890_v5, %v107_v8 }
  0x23   :  { %v2211_v10 = vsel %vm109_vm1, %v1890_v5, %v108_v9 }
  0x88   :  { %v100_v11 = vpop.xlane.xlu0 %99 }
  0x89   :  { %v111_v12 = vmul.f32 %v2211_v10, %v100_v11 }
  0x8b   :  { %v113_v13 = vsub.f32 %v91_v0, %v111_v12 }
  0x8d   :  { %v115_v14 = vmul.f32 %v113_v13, %v113_v13 }
  0x8f   :  { %v117_v15 = vsel %vm97_vm0, %v115_v14, 0.0 }
  0x90   :  { %118 = vadd.xlane.f32.xlu1 %v117_v15  ;;  %v103_v16 = vpop.xlane.xlu0 %102 }
  0x91   :  { %v112_v17 = vmul.f32 %v2211_v10, %v103_v16 }
  0x93   :  { %v114_v18 = vsub.f32 %v92_v2, %v112_v17  ;;  %v94_v17 = vld [vmem:[#allocation5 + $0x8] sm:$0xff] }
  0x95   :  { %v116_v19 = vmul.f32 %v114_v18, %v114_v18 }
  0x97   :  { %v120_v20 = vsel %vm97_vm0, %v116_v19, 0.0 }
  0x98   :  { %121 = vadd.xlane.f32.xlu1 %v120_v20 }
 0x103   :  { %v119_v25 = vpop.xlane.xlu1 %118 }
 0x104   :  { %v123_v26 = vmul.f32 %v119_v25, %v2211_v10 }
 0x106   :  { %v125_v27 = vadd.f32 1e-05, %v123_v26 }
 0x108   :  { %1891 = vrsqrt.f32 %v125_v27  ;;  %vm133_vm3 = vweird.f32 %v125_v27 }
 0x10b   :  { %v122_v28 = vpop.xlane.xlu1 %121 }
 0x10c   :  { %v124_v29 = vmul.f32 %v122_v28, %v2211_v10 }
 0x10e   :  { %v1892_v30 = vpop.eup %1891  ;;  %v126_v31 = vadd.f32 1e-05, %v124_v29 }
 0x10f   :  { %v128_v32 = vmul.f32 %v1892_v30, %v125_v27  ;;  %vm134_vm2 = vweird.f32 %v1892_v30 }
 0x110   :  { %1893 = vrsqrt.f32 %v126_v31  ;;  %vm135_vm4 = vmor %vm133_vm3, %vm134_vm2  ;;  %vm143_vm6 = vweird.f32 %v126_v31 }
 0x111   :  { %v129_v33 = vmul.f32 %v1892_v30, %v128_v32 }
 0x113   :  { %v130_v34 = vmul.f32 0.5, %v129_v33 }
 0x115   :  { %v131_v35 = vsub.f32 1.5, %v130_v34 }
 0x116   :  { %v1894_v36 = vpop.eup %1893 }
 0x117   :  { %v132_v37 = vmul.f32 %v1892_v30, %v131_v35  ;;  %v138_v38 = vmul.f32 %v1894_v36, %v126_v31  ;;  %vm144_vm5 = vweird.f32 %v1894_v36 }
 0x118   :  { %vm145_vm7 = vmor %vm143_vm6, %vm144_vm5 }
 0x119   :  { %v136_v40 = vsel %vm135_vm4, %v1892_v30, %v132_v37  ;;  %v139_v41 = vmul.f32 %v1894_v36, %v138_v38 }
 0x11a   :  { %v147_v42 = vmul.f32 %v136_v40, %v113_v13  ;;  %v93_v13 = vld [vmem:[#allocation5] sm:$0xff] }
 0x11b   :  { %v140_v44 = vmul.f32 0.5, %v139_v41 }
 0x11c   :  { %v150_v45 = vmul.f32 %v1887_v39, %v147_v42 }
 0x11d   :  { %v141_v46 = vsub.f32 1.5, %v140_v44 }
 0x11e   :  { %v2231_v47 = vadd.f32 %v1888_v43, %v150_v45 }
 0x11f   :  { %v142_v48 = vmul.f32 %v1894_v36, %v141_v46 }
 0x120   :  { %1733 = vmatmul.msk.f32.vlgmr.msra.gmra.mxu0 %vm97_vm0, %v2231_v47 }
 0x121   :  { %v146_v49 = vsel %vm145_vm7, %v1894_v36, %v142_v48  ;;  %vm818_vm7 = vcmask 523264  }
 0x122   :  { %v148_v50 = vmul.f32 %v146_v49, %v114_v18 }
 0x124   :  { %v151_v51 = vmul.f32 %v1887_v39, %v148_v50 }
 0x126   :  { %v2235_v52 = vadd.f32 %v1888_v43, %v151_v51 }
 0x128   :  { %1734 = vmatmul.msk.f32.gmra.mxu0 %vm97_vm0, %v2235_v52 }
 0x19d   :  { %v200_v55 = vpop.f32.mrf.mxu0 }
 0x19e   :  { %v201_v56 = vadd.f32 %v200_v55, %v176_v54 }
 0x1a0   :  { %310 = vrot.lane.b32.xlu1 %v201_v56, %s2128_s9  ;;  %v206_v60 = vmul.f32 0.35355338, %v201_v56 }
 0x1a5   :  { %v203_v57 = vpop.f32.mrf.mxu0 }
 0x1a6   :  { %v204_v58 = vadd.f32 %v203_v57, %v176_v54 }
 0x1a8   :  { %408 = vrot.lane.b32.xlu1 %v204_v58, %s2129_s10  ;;  %312 = vrot.lane.b32.xlu0 %v204_v58, %s2128_s9  ;;  %v2245_v59 = vpack.i.bf16 %v201_v56, %v204_v58  ;;  %v207_v61 = vmul.f32 0.35355338, %v204_v58 }
 0x1a9   :  { %212 = vrot.lane.b32.xlu2 %v204_v58, %s2130_s11 }
 0x1b0   :  { %402 = vrot.lane.b32.xlu1 %v206_v60, %s2131_s12  ;;  %502 = vrot.lane.b32.xlu0 %v201_v56, %s2132_s15 }
 0x1b1   :  { %210 = vrot.lane.b32.xlu2 %v201_v56, %s2130_s11 }
 0x1b8   :  { %406 = vrot.lane.b32.xlu0 %v201_v56, %s2129_s10 }
 0x1b9   :  { %306 = vrot.lane.b32.xlu2 %v206_v60, %s2133_s16 }
 0x1c0   :  { %404 = vrot.lane.b32.xlu0 %v207_v61, %s2131_s12 }
 0x1c1   :  { %504 = vrot.lane.b32.xlu2 %v204_v58, %s2132_s15 }
 0x1c9   :  { %308 = vrot.lane.b32.xlu2 %v207_v61, %s2133_s16 }
 0x1d1   :  { %498 = vrot.lane.b32.xlu2 %v206_v60, %s2134_s17 }
 0x1d9   :  { %500 = vrot.lane.b32.xlu2 %v207_v61, %s2134_s17 }
 0x203   :  { %v213_v62 = vpop.permute.xlu2 %212 }
 0x204   :  { %1735 = vmatpush.xpose.msk.msra.mxu1 %vm214_vm8, %v213_v62 }
 0x20b   :  { %v211_v63 = vpop.permute.xlu2 %210 }
 0x20c   :  { %1736 = vmatpush.xpose.msk.msra.mxu1 %vm214_vm8, %v211_v63 }
 0x20f   :  { %1737 = vmatmul.msk.f32.vlgmr.msra.gmra.mxu1 %vm214_vm8, %v206_v60 }
 0x212   :  { %v311_v0 = vpop.permute.xlu1 %310 }
 0x213   :  { %v307_v1 = vpop.permute.xlu2 %306 }
 0x217   :  { %1738 = vmatmul.msk.f32.gmra.mxu1 %vm214_vm8, %v207_v61 }
 0x21a   :  { %v313_v2 = vpop.permute.xlu0 %312  ;;  %v409_v3 = vpop.permute.xlu1 %408 }
 0x21b   :  { %v505_v4 = vpop.permute.xlu2 %504  ;;  %1741 = vmatpush.xpose.msk.msra.mxu3 %vm214_vm8, %v313_v2  ;;  %1747 = vmatpush.xpose.msk.msrb.mxu0 %vm214_vm8, %v409_v3 }
 0x21f   :  { %1742 = vmatpush.xpose.msk.msra.mxu3 %vm214_vm8, %v311_v0 }
 0x222   :  { %v503_v5 = vpop.permute.xlu0 %502  ;;  %1743 = vmatmul.msk.f32.vlgmr.msra.gmra.mxu3 %vm214_vm8, %v307_v1  ;;  %v403_v8 = vpop.permute.xlu1 %402 }
 0x223   :  { %1753 = vmatpush.xpose.msk.msrb.mxu3 %vm214_vm8, %v505_v4  ;;  %v309_v6 = vpop.permute.xlu2 %308 }
 0x227   :  { %1754 = vmatpush.xpose.msk.msrb.mxu3 %vm214_vm8, %v503_v5 }
 0x22a   :  { %v407_v7 = vpop.permute.xlu0 %406  ;;  %1744 = vmatmul.msk.f32.gmra.mxu3 %vm214_vm8, %v309_v6 }
 0x22b   :  { %1748 = vmatpush.xpose.msk.msrb.mxu0 %vm214_vm8, %v407_v7  ;;  %v499_v9 = vpop.permute.xlu2 %498 }
 0x22e   :  { %1749 = vmatmul.msk.f32.vlgmr.msrb.gmra.mxu0 %vm214_vm8, %v403_v8 }
 0x232   :  { %1755 = vmatmul.msk.f32.vlgmr.msrb.gmra.mxu3 %vm214_vm8, %v499_v9  ;;  %v405_v11 = vpop.permute.xlu0 %404 }
 0x233   :  { %v501_v12 = vpop.permute.xlu2 %500 }
 0x236   :  { %1750 = vmatmul.msk.f32.gmra.mxu0 %vm214_vm8, %v405_v11 }
 0x23a   :  { %1756 = vmatmul.msk.f32.gmra.mxu3 %vm214_vm8, %v501_v12 }
 0x28c   :  { %v242_v14 = vpop.f32.mrf.mxu1 }
 0x28d   :  { %v243_v15 = vadd.f32 %v242_v14, %v93_v13 }
 0x28f   :  { %v249_v16 = vsel %vm248_vm9, %v243_v15, -inf }
 0x290   :  { %250 = vmax.xlane.f32.xlu2 %v249_v16 }
 0x294   :  { %v245_v18 = vpop.f32.mrf.mxu1 }
 0x295   :  { %v246_v19 = vadd.f32 %v245_v18, %v94_v17 }
 0x297   :  { %v252_v20 = vsel %vm248_vm9, %v246_v19, -inf }
 0x298   :  { %253 = vmax.xlane.f32.xlu1 %v252_v20 }
 0x2a5   :  { %v339_v21 = vpop.f32.mrf.mxu3 }
 0x2a6   :  { %v340_v28 = vadd.f32 %v339_v21, %v93_v13 }
 0x2a8   :  { %v345_v33 = vsel %vm248_vm9, %v340_v28, -inf }
 0x2ab   :  { %v435_v22 = vpop.f32.mrf.mxu0 }
 0x2ac   :  { %v436_v23 = vadd.f32 %v435_v22, %v93_v13 }
 0x2ad   :  { %v342_v24 = vpop.f32.mrf.mxu3 }
 0x2ae   :  { %v2276_v25 = vadd.f32 %v342_v24, %v94_v17  ;;  %v441_v26 = vsel %vm248_vm9, %v436_v23, -inf }
 0x2af   :  { %442 = vmax.xlane.f32.xlu0 %v441_v26 }
 0x2b0   :  { %v348_v27 = vsel %vm248_vm9, %v2276_v25, -inf }
 0x2b1   :  { %349 = vmax.xlane.f32.xlu2 %v348_v27 }
 0x2b3   :  { %v438_v29 = vpop.f32.mrf.mxu0 }
 0x2b4   :  { %v2281_v30 = vadd.f32 %v438_v29, %v94_v17 }
 0x2b5   :  { %v531_v31 = vpop.f32.mrf.mxu3 }
 0x2b6   :  { %v444_v32 = vsel %vm248_vm9, %v2281_v30, -inf  ;;  %v532_v34 = vadd.f32 %v531_v31, %v93_v13 }
 0x2b7   :  { %445 = vmax.xlane.f32.xlu1 %v444_v32  ;;  %346 = vmax.xlane.f32.xlu0 %v345_v33 }
 0x2b8   :  { %v537_v37 = vsel %vm248_vm9, %v532_v34, -inf }
 0x2bd   :  { %v534_v35 = vpop.f32.mrf.mxu3 }
 0x2be   :  { %v535_v36 = vadd.f32 %v534_v35, %v94_v17 }
 0x2bf   :  { %538 = vmax.xlane.f32.xlu1 %v537_v37 }
 0x2c0   :  { %v540_v38 = vsel %vm248_vm9, %v535_v36, -inf }
 0x2c1   :  { %541 = vmax.xlane.f32.xlu2 %v540_v38 }
 0x2d9   :  { %1848 = vrot.lane.b32.xlu2 %v2245_v59, %s2135_s18 }
 0x303   :  { %v251_v39 = vpop.xlane.xlu2 %250 }
 0x304   :  { %v255_v40 = vsub.f32 %v243_v15, %v251_v39 }
 0x306   :  { %v257_v41 = vmul.f32 1.442695, %v255_v40 }
 0x308   :  { %1895 = vpow2.f32 %v257_v41 }
 0x30b   :  { %v254_v42 = vpop.xlane.xlu1 %253 }
 0x30c   :  { %v256_v43 = vsub.f32 %v246_v19, %v254_v42 }
 0x30e   :  { %v1896_v44 = vpop.eup %1895  ;;  %v259_v45 = vmul.f32 1.442695, %v256_v43 }
 0x30f   :  { %v261_v46 = vsel %vm248_vm9, %v1896_v44, 0.0 }
 0x310   :  { %1897 = vpow2.f32 %v259_v45  ;;  %262 = vadd.xlane.f32.xlu0 %v261_v46 }
 0x316   :  { %v1898_v48 = vpop.eup %1897 }
 0x317   :  { %v264_v49 = vsel %vm248_vm9, %v1898_v48, 0.0 }
 0x318   :  { %265 = vadd.xlane.f32.xlu1 %v264_v49 }
 0x322   :  { %v443_v50 = vpop.xlane.xlu0 %442 }
 0x323   :  { %v447_v51 = vsub.f32 %v436_v23, %v443_v50 }
 0x324   :  { %v350_v57 = vpop.xlane.xlu2 %349 }
 0x325   :  { %v449_v54 = vmul.f32 1.442695, %v447_v51  ;;  %v352_v9 = vsub.f32 %v2276_v25, %v350_v57 }
 0x327   :  { %1899 = vpow2.f32 %v449_v54  ;;  %v355_v11 = vmul.f32 1.442695, %v352_v9 }
 0x32a   :  { %v347_v55 = vpop.xlane.xlu0 %346  ;;  %v446_v8 = vpop.xlane.xlu1 %445 }
 0x32b   :  { %v351_v56 = vsub.f32 %v340_v28, %v347_v55  ;;  %v448_v28 = vsub.f32 %v2281_v30, %v446_v8 }
 0x32d   :  { %v2292_v58 = vpop.eup %1899  ;;  %v353_v60 = vmul.f32 1.442695, %v351_v56  ;;  %v451_v31 = vmul.f32 1.442695, %v448_v28 }
 0x32e   :  { %v453_v61 = vsel %vm248_vm9, %v2292_v58, 0.0 }
 0x32f   :  { %1901 = vpow2.f32 %v353_v60  ;;  %454 = vadd.xlane.f32.xlu2 %v453_v61 }
 0x331   :  { %1853 = vrot.lane.b32.xlu1 %v2245_v59, %s2136_s1 }
 0x332   :  { %v539_v12 = vpop.xlane.xlu1 %538 }
 0x333   :  { %v543_v13 = vsub.f32 %v532_v34, %v539_v12 }
 0x334   :  { %v542_v62 = vpop.xlane.xlu2 %541 }
 0x335   :  { %v1902_v63 = vpop.eup %1901  ;;  %v544_v4 = vsub.f32 %v535_v36, %v542_v62  ;;  %v545_v14 = vmul.f32 1.442695, %v543_v13 }
 0x336   :  { %v357_v0 = vsel %vm248_vm9, %v1902_v63, 0.0 }
 0x337   :  { %358 = vadd.xlane.f32.xlu0 %v357_v0  ;;  %v547_v5 = vmul.f32 1.442695, %v544_v4  ;;  %v161_v4 = vld [vmem:[%s2651_s4 + $0x10] sm:$0xff] }
 0x339   :  { %1903 = vpow2.f32 %v547_v5  ;;  %v160_v5 = vld [vmem:[%s2651_s4 + $0x8] sm:$0xff] }
 0x33a   :  { %1905 = vpow2.f32 %v355_v11 }
 0x33b   :  { %1907 = vpow2.f32 %v545_v14 }
 0x33c   :  { %v1849_v1 = vpop.permute.xlu2 %1848 }
 0x33d   :  { %v1850_v2 = vunpack.i.l.bf16 %v1849_v1  ;;  %v1851_v3 = vunpack.i.h.bf16 %v1849_v1 }
 0x33f   :  { %297 = vmatpush.msra.mxu2 %v1850_v2  ;;  %v2301_v6 = vpop.eup %1903 }
 0x340   :  { %v552_v7 = vsel %vm248_vm9, %v2301_v6, 0.0  ;;  %v1906_v15 = vpop.eup %1905 }
 0x341   :  { %298 = vmatpush.msra.mxu2 %v1851_v3  ;;  %v360_v16 = vsel %vm248_vm9, %v1906_v15, 0.0  ;;  %v1908_v17 = vpop.eup %1907  ;;  %v162_v3 = vld [vmem:[%s2651_s4 + $0x18] sm:$0xff] }
 0x342   :  { %v549_v18 = vsel %vm248_vm9, %v1908_v17, 0.0  ;;  %644 = vmatpush.msra.mxu0 %v162_v3 }
 0x344   :  { %645 = vmatpush.msra.mxu0 %v161_v4 }
 0x346   :  { %646 = vmatpush.msra.mxu0 %v160_v5 }
 0x34b   :  { %1858 = vrot.lane.b32.xlu0 %v2245_v59, %s2137_s0 }
 0x35b   :  { %553 = vadd.xlane.f32.xlu1 %v552_v7 }
 0x375   :  { %361 = vadd.xlane.f32.xlu0 %v360_v16 }
 0x37d   :  { %550 = vadd.xlane.f32.xlu0 %v549_v18 }
 0x383   :  { %v263_v19 = vpop.xlane.xlu0 %262 }
 0x384   :  { %1909 = vrcp.f32 %v263_v19 }
 0x38a   :  { %v1910_v20 = vpop.eup %1909 }
 0x38b   :  { %v266_v21 = vpop.xlane.xlu1 %265  ;;  %v269_v22 = vmul.f32 %v1910_v20, %v1896_v44  ;;  %v625_v20 = vperm.slane %v2239_v53, 1 }
 0x38c   :  { %1911 = vrcp.f32 %v266_v21 }
 0x38d   :  { %1739 = vmatmul.msk.f32.vlgmr.msra.gmra.mxu2 %vm248_vm9, %v269_v22 }
 0x391   :  { %1863 = vrot.lane.b32.xlu0 %v2245_v59, %s2138_s19 }
 0x392   :  { %v1912_v23 = vpop.eup %1911 }
 0x393   :  { %v270_v24 = vmul.f32 %v1912_v23, %v1898_v48 }
 0x395   :  { %1740 = vmatmul.msk.f32.gmra.mxu2 %vm248_vm9, %v270_v24 }
 0x3a2   :  { %v455_v44 = vpop.xlane.xlu2 %454 }
 0x3a3   :  { %v1854_v25 = vpop.permute.xlu1 %1853 }
 0x3a4   :  { %v1855_v26 = vunpack.i.l.bf16 %v1854_v25  ;;  %v1856_v27 = vunpack.i.h.bf16 %v1854_v25 }
 0x3a6   :  { %393 = vmatpush.msrb.mxu2 %v1855_v26 }
 0x3a8   :  { %394 = vmatpush.msrb.mxu2 %v1856_v27 }
 0x3aa   :  { %v359_v29 = vpop.xlane.xlu0 %358 }
 0x3ab   :  { %1913 = vrcp.f32 %v359_v29 }
 0x3ac   :  { %1915 = vpow2.f32 %v451_v31 }
 0x3b1   :  { %v1914_v32 = vpop.eup %1913 }
 0x3b2   :  { %v365_v33 = vmul.f32 %v1914_v32, %v1902_v63  ;;  %v1916_v59 = vpop.eup %1915 }
 0x3b3   :  { %v456_v34 = vsel %vm248_vm9, %v1916_v59, 0.0 }
 0x3b4   :  { %1745 = vmatmul.msk.f32.vlgmr.msrb.gmra.mxu2 %vm248_vm9, %v365_v33 }
 0x3bb   :  { %457 = vadd.xlane.f32.xlu0 %v456_v34 }
 0x3bd   :  { %v1859_v35 = vpop.permute.xlu0 %1858 }
 0x3be   :  { %v1860_v36 = vunpack.i.l.bf16 %v1859_v35  ;;  %v1861_v37 = vunpack.i.h.bf16 %v1859_v35 }
 0x3c0   :  { %585 = vmatpush.msra.mxu2 %v1860_v36 }
 0x3c2   :  { %586 = vmatpush.msra.mxu2 %v1861_v37 }
 0x3ce   :  { %v554_v41 = vpop.xlane.xlu1 %553 }
 0x3e8   :  { %v362_v38 = vpop.xlane.xlu0 %361 }
 0x3e9   :  { %1917 = vrcp.f32 %v362_v38  ;;  %v165_v38 = vld [vmem:[%s2652_s5 + $0x10] sm:$0xff] }
 0x3ef   :  { %v1918_v30 = vpop.eup %1917 }
 0x3f0   :  { %v551_v39 = vpop.xlane.xlu0 %550  ;;  %v366_v40 = vmul.f32 %v1918_v30, %v1906_v15  ;;  %v164_v30 = vld [vmem:[%s2652_s5 + $0x8] sm:$0xff] }
 0x3f1   :  { %1919 = vrcp.f32 %v551_v39  ;;  %v163_v39 = vld [vmem:[%s2652_s5] sm:$0xff] }
 0x3f2   :  { %1746 = vmatmul.msk.f32.gmra.mxu2 %vm248_vm9, %v366_v40  ;;  %1921 = vrcp.f32 %v554_v41 }
 0x3f3   :  { %1923 = vrcp.f32 %v455_v44 }
 0x3f7   :  { %v1920_v42 = vpop.eup %1919 }
 0x3f8   :  { %v557_v43 = vmul.f32 %v1920_v42, %v1908_v17  ;;  %v1922_v45 = vpop.eup %1921 }
 0x3f9   :  { %v558_v46 = vmul.f32 %v1922_v45, %v2301_v6  ;;  %v1924_v49 = vpop.eup %1923  ;;  %v159_v6 = vld [vmem:[%s2651_s4] sm:$0xff] }
 0x3fa   :  { %1757 = vmatmul.msk.f32.vlgmr.msra.gmra.mxu2 %vm248_vm9, %v557_v43  ;;  %v461_v54 = vmul.f32 %v1924_v49, %v2292_v58  ;;  %647 = vmatpush.msra.mxu0 %v159_v6 }
 0x402   :  { %1758 = vmatmul.msk.f32.gmra.mxu2 %vm248_vm9, %v558_v46 }
 0x403   :  { %v1864_v48 = vpop.permute.xlu0 %1863 }
 0x404   :  { %v1865_v50 = vunpack.i.l.bf16 %v1864_v48  ;;  %v1866_v51 = vunpack.i.h.bf16 %v1864_v48 }
 0x406   :  { %489 = vmatpush.msrb.mxu1 %v1865_v50  ;;  %v701_v50 = vperm.slane %v2239_v53, 4 }
 0x408   :  { %490 = vmatpush.msrb.mxu1 %v1866_v51 }
 0x409   :  { %1751 = vmatmul.msk.f32.vlgmr.msrb.gmra.mxu1 %vm248_vm9, %v461_v54 }
 0x410   :  { %v300_v55 = vpop.f32.mrf.mxu2 }
 0x418   :  { %v303_v57 = vpop.f32.mrf.mxu2 }
 0x42e   :  { %v458_v56 = vpop.xlane.xlu0 %457 }
 0x42f   :  { %1925 = vrcp.f32 %v458_v56 }
 0x435   :  { %v1926_v60 = vpop.eup %1925 }
 0x436   :  { %v462_v61 = vmul.f32 %v1926_v60, %v1916_v59 }
 0x437   :  { %v396_v62 = vpop.f32.mrf.mxu2 }
 0x438   :  { %1752 = vmatmul.msk.f32.gmra.mxu1 %vm248_vm9, %v462_v61  ;;  %596 = vrot.lane.b32.xlu2 %v396_v62, %s2123_s14 }
 0x475   :  { %v399_v63 = vpop.f32.mrf.mxu2 }
 0x47d   :  { %v588_v0 = vpop.f32.mrf.mxu2 }
 0x47e   :  { %612 = vrot.lane.b32.xlu2 %v588_v0, %s2139_s20 }
 0x485   :  { %v591_v1 = vpop.f32.mrf.mxu2 }
 0x486   :  { %v492_v58 = vpop.f32.mrf.mxu1  ;;  %598 = vrot.lane.b32.xlu2 %v399_v63, %s2123_s14 }
 0x487   :  { %604 = vrot.lane.b32.xlu1 %v492_v58, %s2140_s21 }
 0x48f   :  { %614 = vrot.lane.b32.xlu1 %v591_v1, %s2139_s20 }
 0x492   :  { %v597_v7 = vpop.permute.xlu2 %596 }
 0x493   :  { %v618_v8 = vsel %vm214_vm8, %v300_v55, %v597_v7  ;;  %v704_v55 = vperm.slane %v2239_v53, 5 }
 0x4b5   :  { %v495_v2 = vpop.f32.mrf.mxu1 }
 0x4b6   :  { %606 = vrot.lane.b32.xlu0 %v495_v2, %s2140_s21 }
 0x4d8   :  { %v613_v11 = vpop.permute.xlu2 %612 }
 0x4e0   :  { %v599_v14 = vpop.permute.xlu2 %598 }
 0x4e1   :  { %v619_v15 = vsel %vm214_vm8, %v303_v57, %v599_v14 }
 0x4f9   :  { %v605_v9 = vpop.permute.xlu1 %604 }
 0x4fa   :  { %v620_v12 = vsel %vm248_vm9, %v618_v8, %v605_v9  ;;  %v707_v8 = vperm.slane %v2239_v53, 2 }
 0x4fb   :  { %v623_v13 = vsel %vm622_vm10, %v620_v12, %v613_v11 }
 0x4fc   :  { %1759 = vmatmul.msk.f32.vlgmr.msra.gmra.mxu0 %vm97_vm0, %v623_v13 }
 0x501   :  { %v615_v17 = vpop.permute.xlu1 %614 }
 0x528   :  { %v607_v16 = vpop.permute.xlu0 %606 }
 0x529   :  { %v621_v18 = vsel %vm248_vm9, %v619_v15, %v607_v16  ;;  %v174_v16 = vld [vmem:[%s2653_s6 + $0x38] sm:$0xff] }
 0x52a   :  { %v624_v19 = vsel %vm622_vm10, %v621_v18, %v615_v17  ;;  %833 = vmatpush.msra.mxu3 %v174_v16  ;;  %v173_v17 = vld [vmem:[%s2653_s6 + $0x30] sm:$0xff]  ;;  %v172_v18 = vld [vmem:[%s2653_s6 + $0x28] sm:$0xff] }
 0x52b   :  { %1760 = vmatmul.msk.f32.gmra.mxu0 %vm97_vm0, %v624_v19  ;;  %v171_v19 = vld [vmem:[%s2653_s6 + $0x20] sm:$0xff] }
 0x52c   :  { %834 = vmatpush.msra.mxu3 %v173_v17 }
 0x52e   :  { %835 = vmatpush.msra.mxu3 %v172_v18 }
 0x530   :  { %836 = vmatpush.msra.mxu3 %v171_v19 }
 0x579   :  { %v649_v21 = vpop.f32.mrf.mxu0 }
 0x57a   :  { %v650_v22 = vadd.f32 %v649_v21, %v625_v20 }
 0x57c   :  { %v655_v23 = vadd.f32 %v650_v22, %v2231_v47  ;;  %v170_v22 = vld [vmem:[%s2653_s6 + $0x18] sm:$0xff] }
 0x57d   :  { %837 = vmatpush.msra.mxu3 %v170_v22 }
 0x57e   :  { %v657_v24 = vsel %vm97_vm0, %v655_v23, 0.0 }
 0x57f   :  { %658 = vadd.xlane.f32.xlu2 %v657_v24  ;;  %v169_v24 = vld [vmem:[%s2653_s6 + $0x10] sm:$0xff] }
 0x580   :  { %838 = vmatpush.msra.mxu3 %v169_v24 }
 0x5a8   :  { %v652_v25 = vpop.f32.mrf.mxu0 }
 0x5a9   :  { %v653_v26 = vadd.f32 %v652_v25, %v625_v20 }
 0x5ab   :  { %v656_v27 = vadd.f32 %v653_v26, %v2235_v52  ;;  %v166_v52 = vld [vmem:[%s2652_s5 + $0x18] sm:$0xff] }
 0x5ac   :  { %726 = vmatpush.msra.mxu1 %v166_v52 }
 0x5ad   :  { %v660_v28 = vsel %vm97_vm0, %v656_v27, 0.0 }
 0x5ae   :  { %661 = vadd.xlane.f32.xlu1 %v660_v28  ;;  %727 = vmatpush.msra.mxu1 %v165_v38  ;;  %v168_v28 = vld [vmem:[%s2653_s6 + $0x8] sm:$0xff] }
 0x5af   :  { %839 = vmatpush.msra.mxu3 %v168_v28 }
 0x5b0   :  { %728 = vmatpush.msra.mxu1 %v164_v30 }
 0x5b2   :  { %729 = vmatpush.msra.mxu1 %v163_v39 }
 0x5f2   :  { %v659_v29 = vpop.xlane.xlu2 %658 }
 0x5f3   :  { %v663_v31 = vmul.f32 %v659_v29, %v2211_v10 }
 0x5f5   :  { %v665_v32 = vsub.f32 %v655_v23, %v663_v31  ;;  %v167_v31 = vld [vmem:[%s2653_s6] sm:$0xff] }
 0x5f6   :  { %840 = vmatpush.msra.mxu3 %v167_v31  ;;  %v817_v31 = vperm.slane %v2239_v53, 3 }
 0x5f7   :  { %v667_v33 = vmul.f32 %v665_v32, %v665_v32 }
 0x5f9   :  { %v669_v59 = vsel %vm97_vm0, %v667_v33, 0.0 }
 0x5fa   :  { %670 = vadd.xlane.f32.xlu0 %v669_v59 }
 0x621   :  { %v662_v34 = vpop.xlane.xlu1 %661 }
 0x622   :  { %v664_v47 = vmul.f32 %v662_v34, %v2211_v10 }
 0x624   :  { %v666_v35 = vsub.f32 %v656_v27, %v664_v47 }
 0x626   :  { %v668_v36 = vmul.f32 %v666_v35, %v666_v35 }
 0x628   :  { %v672_v37 = vsel %vm97_vm0, %v668_v36, 0.0 }
 0x629   :  { %673 = vadd.xlane.f32.xlu2 %v672_v37 }
 0x66d   :  { %v671_v40 = vpop.xlane.xlu0 %670 }
 0x66e   :  { %v675_v41 = vmul.f32 %v671_v40, %v2211_v10 }
 0x670   :  { %v677_v42 = vadd.f32 1e-05, %v675_v41 }
 0x672   :  { %1927 = vrsqrt.f32 %v677_v42  ;;  %vm685_vm12 = vweird.f32 %v677_v42 }
 0x678   :  { %v1928_v43 = vpop.eup %1927 }
 0x679   :  { %v680_v44 = vmul.f32 %v1928_v43, %v677_v42  ;;  %vm686_vm11 = vweird.f32 %v1928_v43 }
 0x67a   :  { %vm687_vm13 = vmor %vm685_vm12, %vm686_vm11 }
 0x67b   :  { %v681_v45 = vmul.f32 %v1928_v43, %v680_v44 }
 0x67d   :  { %v682_v46 = vmul.f32 0.5, %v681_v45 }
 0x67f   :  { %v683_v48 = vsub.f32 1.5, %v682_v46 }
 0x681   :  { %v684_v49 = vmul.f32 %v1928_v43, %v683_v48 }
 0x683   :  { %v688_v51 = vsel %vm687_vm13, %v1928_v43, %v684_v49 }
 0x684   :  { %v699_v54 = vmul.f32 %v688_v51, %v665_v32 }
 0x686   :  { %v702_v56 = vmul.f32 %v701_v50, %v699_v54 }
 0x688   :  { %v2372_v57 = vadd.f32 %v704_v55, %v702_v56 }
 0x68a   :  { %1761 = vmatmul.msk.f32.vlgmr.msra.gmra.mxu1 %vm97_vm0, %v2372_v57 }
 0x69c   :  { %v674_v60 = vpop.xlane.xlu2 %673 }
 0x69d   :  { %v676_v61 = vmul.f32 %v674_v60, %v2211_v10 }
 0x69f   :  { %v678_v62 = vadd.f32 1e-05, %v676_v61 }
 0x6a1   :  { %1929 = vrsqrt.f32 %v678_v62  ;;  %vm695_vm15 = vweird.f32 %v678_v62 }
 0x6a7   :  { %v1930_v63 = vpop.eup %1929 }
 0x6a8   :  { %v690_v0 = vmul.f32 %v1930_v63, %v678_v62  ;;  %vm696_vm14 = vweird.f32 %v1930_v63 }
 0x6a9   :  { %vm697_vm1 = vmor %vm695_vm15, %vm696_vm14 }
 0x6aa   :  { %v691_v58 = vmul.f32 %v1930_v63, %v690_v0 }
 0x6ac   :  { %v692_v1 = vmul.f32 0.5, %v691_v58 }
 0x6ae   :  { %v693_v2 = vsub.f32 1.5, %v692_v1 }
 0x6b0   :  { %v694_v3 = vmul.f32 %v1930_v63, %v693_v2 }
 0x6b2   :  { %v698_v4 = vsel %vm697_vm1, %v1930_v63, %v694_v3 }
 0x6b3   :  { %v700_v5 = vmul.f32 %v698_v4, %v666_v35 }
 0x6b5   :  { %v703_v6 = vmul.f32 %v701_v50, %v700_v5 }
 0x6b7   :  { %v2377_v7 = vadd.f32 %v704_v55, %v703_v6 }
 0x6b9   :  { %1762 = vmatmul.msk.f32.gmra.mxu1 %vm97_vm0, %v2377_v7 }
 0x707   :  { %v731_v9 = vpop.f32.mrf.mxu1 }
 0x708   :  { %v732_v11 = vadd.f32 %v731_v9, %v707_v8 }
 0x70a   :  { %v739_v12 = vmul.f32 0.70710677, %v732_v11  ;;  %v737_v55 = vmul.f32 0.5, %v732_v11 }
 0x70c   :  { %v741_v13 = vand.u32 2147483647, %v739_v12  ;;  %vm807_vm6 = vcmp.ge.f32.partialorder %v739_v12, 0.0 }
 0x70e   :  { %v743_v14 = vmul.f32 0.3275911, %v741_v13  ;;  %v795_v34 = vsub.f32 0.0, %v741_v13 }
 0x710   :  { %v745_v15 = vadd.f32 1.0, %v743_v14  ;;  %v797_v36 = vmul.f32 %v795_v34, %v741_v13 }
 0x712   :  { %1931 = vrcp.f32 %v745_v15  ;;  %v758_v25 = vand.u32 2147483648, %v745_v15  ;;  %v756_v27 = vand.u32 2147483647, %v745_v15  ;;  %vm752_vm3 = vweird.f32 %v745_v15 }
 0x713   :  { %v799_v38 = vmul.f32 1.442695, %v797_v36 }
 0x714   :  { %v759_v32 = vor.u32 1.1754944e-38, %v758_v25  ;;  %vm757_vm5 = vcmp.eq.f32.partialorder %v756_v27, 8.507059e+37 }
 0x715   :  { %1933 = vpow2.f32 %v799_v38 }
 0x718   :  { %v1932_v20 = vpop.eup %1931 }
 0x719   :  { %v748_v21 = vmul.f32 %v1932_v20, %v745_v15  ;;  %vm753_vm2 = vweird.f32 %v1932_v20 }
 0x71a   :  { %vm754_vm4 = vmor %vm752_vm3, %vm753_vm2 }
 0x71b   :  { %v749_v23 = vsub.f32 1.0, %v748_v21  ;;  %v1934_v43 = vpop.eup %1933 }
 0x71d   :  { %v750_v26 = vmul.f32 %v1932_v20, %v749_v23 }
 0x71f   :  { %v751_v29 = vadd.f32 %v1932_v20, %v750_v26 }
 0x721   :  { %v755_v33 = vsel %vm754_vm4, %v1932_v20, %v751_v29 }
 0x722   :  { %v760_v59 = vsel %vm757_vm5, %v759_v32, %v755_v33 }
 0x723   :  { %v777_v47 = vmul.f32 1.0614054, %v760_v59 }
 0x725   :  { %v779_v35 = vadd.f32 -1.4531521, %v777_v47 }
 0x727   :  { %v781_v37 = vmul.f32 %v779_v35, %v760_v59 }
 0x729   :  { %v783_v52 = vadd.f32 1.4214138, %v781_v37 }
 0x72b   :  { %v785_v30 = vmul.f32 %v783_v52, %v760_v59 }
 0x72d   :  { %v787_v39 = vadd.f32 -0.28449672, %v785_v30 }
 0x72f   :  { %v789_v40 = vmul.f32 %v787_v39, %v760_v59 }
 0x731   :  { %v791_v41 = vadd.f32 0.2548296, %v789_v40 }
 0x733   :  { %v793_v42 = vmul.f32 %v791_v41, %v760_v59 }
 0x735   :  { %v803_v44 = vmul.f32 %v1934_v43, %v793_v42 }
 0x736   :  { %v734_v45 = vpop.f32.mrf.mxu1 }
 0x737   :  { %v805_v46 = vsub.f32 1.0, %v803_v44  ;;  %v735_v48 = vadd.f32 %v734_v45, %v707_v8 }
 0x739   :  { %v809_v49 = vsub.f32 0.0, %v805_v46  ;;  %v740_v50 = vmul.f32 0.70710677, %v735_v48  ;;  %v738_v27 = vmul.f32 0.5, %v735_v48 }
 0x73b   :  { %v811_v51 = vsel %vm807_vm6, %v805_v46, %v809_v49  ;;  %v742_v54 = vand.u32 2147483647, %v740_v50  ;;  %vm808_vm15 = vcmp.ge.f32.partialorder %v740_v50, 0.0 }
 0x73c   :  { %v813_v56 = vadd.f32 1.0, %v811_v51 }
 0x73d   :  { %v744_v60 = vmul.f32 0.3275911, %v742_v54  ;;  %v796_v8 = vsub.f32 0.0, %v742_v54 }
 0x73e   :  { %v815_v61 = vmul.f32 %v813_v56, %v737_v55 }
 0x73f   :  { %v746_v62 = vadd.f32 1.0, %v744_v60  ;;  %v798_v13 = vmul.f32 %v796_v8, %v742_v54 }
 0x740   :  { %1763 = vmatmul.msk.f32.vlgmr.msra.gmra.mxu3 %vm818_vm7, %v815_v61 }
 0x741   :  { %1935 = vrcp.f32 %v746_v62  ;;  %v773_v1 = vand.u32 2147483648, %v746_v62  ;;  %v771_v3 = vand.u32 2147483647, %v746_v62  ;;  %vm767_vm12 = vweird.f32 %v746_v62 }
 0x742   :  { %v801_v16 = vmul.f32 1.442695, %v798_v13 }
 0x743   :  { %v774_v5 = vor.u32 1.1754944e-38, %v773_v1  ;;  %vm772_vm14 = vcmp.eq.f32.partialorder %v771_v3, 8.507059e+37  ;;  %v897_v3 = vperm.slane %v2239_v53, 7 }
 0x744   :  { %1937 = vpow2.f32 %v801_v16 }
 0x747   :  { %v1936_v63 = vpop.eup %1935 }
 0x748   :  { %v763_v0 = vmul.f32 %v1936_v63, %v746_v62  ;;  %vm768_vm11 = vweird.f32 %v1936_v63 }
 0x749   :  { %vm769_vm13 = vmor %vm767_vm12, %vm768_vm11 }
 0x74a   :  { %v764_v58 = vsub.f32 1.0, %v763_v0  ;;  %v1938_v22 = vpop.eup %1937 }
 0x74c   :  { %v765_v2 = vmul.f32 %v1936_v63, %v764_v58 }
 0x74e   :  { %v766_v4 = vadd.f32 %v1936_v63, %v765_v2 }
 0x750   :  { %v770_v6 = vsel %vm769_vm13, %v1936_v63, %v766_v4  ;;  %v894_v63 = vperm.slane %v2239_v53, 6  ;;  %v2141_v53 = vmov 0.0  }
 0x751   :  { %v775_v9 = vsel %vm772_vm14, %v774_v5, %v770_v6 }
 0x752   :  { %v778_v11 = vmul.f32 1.0614054, %v775_v9 }
 0x754   :  { %v780_v12 = vadd.f32 -1.4531521, %v778_v11 }
 0x756   :  { %v782_v14 = vmul.f32 %v780_v12, %v775_v9 }
 0x758   :  { %v784_v15 = vadd.f32 1.4214138, %v782_v14 }
 0x75a   :  { %v786_v17 = vmul.f32 %v784_v15, %v775_v9 }
 0x75c   :  { %v788_v18 = vadd.f32 -0.28449672, %v786_v17 }
 0x75e   :  { %v790_v19 = vmul.f32 %v788_v18, %v775_v9 }
 0x760   :  { %v792_v20 = vadd.f32 0.2548296, %v790_v19 }
 0x762   :  { %v794_v21 = vmul.f32 %v792_v20, %v775_v9 }
 0x764   :  { %v804_v23 = vmul.f32 %v1938_v22, %v794_v21 }
 0x766   :  { %v806_v24 = vsub.f32 1.0, %v804_v23 }
 0x768   :  { %v810_v25 = vsub.f32 0.0, %v806_v24 }
 0x76a   :  { %v812_v26 = vsel %vm808_vm15, %v806_v24, %v810_v25 }
 0x76b   :  { %v814_v28 = vadd.f32 1.0, %v812_v26 }
 0x76d   :  { %v816_v29 = vmul.f32 %v814_v28, %v738_v27 }
 0x76f   :  { %1764 = vmatmul.msk.f32.gmra.mxu3 %vm818_vm7, %v816_v29  ;;  %v1770_v29 = vld [vmem:[%s2650_s3 + $0x38] sm:$0xff] }
 0x770   :  { %977 = vmatpush.msrb.mxu2 %v1770_v29 }
 0x7c3   :  { %v842_v32 = vpop.f32.mrf.mxu3 }
 0x7c4   :  { %v843_v33 = vadd.f32 %v842_v32, %v817_v31  ;;  %v1768_v32 = vld [vmem:[%s2650_s3 + $0x28] sm:$0xff] }
 0x7c6   :  { %v848_v59 = vadd.f32 %v843_v33, %v2372_v57  ;;  %v1767_v33 = vld [vmem:[%s2650_s3 + $0x20] sm:$0xff] }
 0x7c8   :  { %v850_v34 = vsel %vm97_vm0, %v848_v59, 0.0 }
 0x7c9   :  { %851 = vadd.xlane.f32.xlu1 %v850_v34 }
 0x7f2   :  { %v845_v47 = vpop.f32.mrf.mxu3 }
 0x7f3   :  { %v846_v35 = vadd.f32 %v845_v47, %v817_v31  ;;  %v1769_v31 = vld [vmem:[%s2650_s3 + $0x30] sm:$0xff] }
 0x7f4   :  { %978 = vmatpush.msrb.mxu2 %v1769_v31 }
 0x7f5   :  { %v849_v36 = vadd.f32 %v846_v35, %v2377_v7 }
 0x7f6   :  { %979 = vmatpush.msrb.mxu2 %v1768_v32 }
 0x7f7   :  { %v853_v37 = vsel %vm97_vm0, %v849_v36, 0.0 }
 0x7f8   :  { %854 = vadd.xlane.f32.xlu2 %v853_v37  ;;  %980 = vmatpush.msrb.mxu2 %v1767_v33  ;;  %v2445_v37 = vld [vmem:[#allocation8 + $0x8] sm:$0xff] }
 0x83c   :  { %v852_v52 = vpop.xlane.xlu1 %851 }
 0x83d   :  { %v856_v38 = vmul.f32 %v852_v52, %v2211_v10  ;;  %v958_v52 = vperm.slane %v2445_v37, 0 }
 0x83f   :  { %v858_v30 = vsub.f32 %v848_v59, %v856_v38 }
 0x841   :  { %v860_v39 = vmul.f32 %v858_v30, %v858_v30 }
 0x843   :  { %v862_v40 = vsel %vm97_vm0, %v860_v39, 0.0 }
 0x844   :  { %863 = vadd.xlane.f32.xlu1 %v862_v40 }
 0x86b   :  { %v855_v41 = vpop.xlane.xlu2 %854 }
 0x86c   :  { %v857_v57 = vmul.f32 %v855_v41, %v2211_v10 }
 0x86e   :  { %v859_v42 = vsub.f32 %v849_v36, %v857_v57 }
 0x870   :  { %v861_v43 = vmul.f32 %v859_v42, %v859_v42 }
 0x872   :  { %v865_v44 = vsel %vm97_vm0, %v861_v43, 0.0 }
 0x873   :  { %866 = vadd.xlane.f32.xlu0 %v865_v44 }
 0x8b7   :  { %v864_v7 = vpop.xlane.xlu1 %863 }
 0x8b8   :  { %v868_v45 = vmul.f32 %v864_v7, %v2211_v10 }
 0x8ba   :  { %v870_v46 = vadd.f32 1e-05, %v868_v45 }
 0x8bc   :  { %1939 = vrsqrt.f32 %v870_v46  ;;  %vm878_vm2 = vweird.f32 %v870_v46 }
 0x8c2   :  { %v1940_v48 = vpop.eup %1939 }
 0x8c3   :  { %v873_v49 = vmul.f32 %v1940_v48, %v870_v46  ;;  %vm879_vm1 = vweird.f32 %v1940_v48 }
 0x8c4   :  { %vm880_vm3 = vmor %vm878_vm2, %vm879_vm1 }
 0x8c5   :  { %v874_v50 = vmul.f32 %v1940_v48, %v873_v49 }
 0x8c7   :  { %v875_v51 = vmul.f32 0.5, %v874_v50 }
 0x8c9   :  { %v876_v54 = vsub.f32 1.5, %v875_v51 }
 0x8cb   :  { %v877_v60 = vmul.f32 %v1940_v48, %v876_v54 }
 0x8cd   :  { %v881_v62 = vsel %vm880_vm3, %v1940_v48, %v877_v60 }
 0x8ce   :  { %v892_v0 = vmul.f32 %v881_v62, %v858_v30 }
 0x8d0   :  { %v895_v2 = vmul.f32 %v894_v63, %v892_v0 }
 0x8d2   :  { %v898_v6 = vadd.f32 %v897_v3, %v895_v2 }
 0x8d4   :  { %v902_v11 = vand.u32 2147483647, %v898_v6  ;;  %vm900_vm12 = vcmp.ne.f32.partialorder %v898_v6, %v898_v6  ;;  %v1765_v59 = vclamps-f32 %v898_v6, 3.4028235e+38 }
 0x8d6   :  { %vm904_vm11 = vcmp.eq.f32.partialorder %v902_v11, inf }
 0x8d7   :  { %vm906_vm13 = vmor %vm900_vm12, %vm904_vm11 }
 0x8d8   :  { %v908_v17 = vsel %vm906_vm13, 1.0, %v2141_v53 }
 0x8d9   :  { %v910_v19 = vsel %vm97_vm0, %v908_v17, -inf }
 0x8e6   :  { %v867_v55 = vpop.xlane.xlu0 %866 }
 0x8e7   :  { %v869_v56 = vmul.f32 %v867_v55, %v2211_v10 }
 0x8e9   :  { %v871_v61 = vadd.f32 1e-05, %v869_v56 }
 0x8eb   :  { %1941 = vrsqrt.f32 %v871_v61  ;;  %vm888_vm5 = vweird.f32 %v871_v61 }
 0x8f1   :  { %v1942_v58 = vpop.eup %1941 }
 0x8f2   :  { %v883_v1 = vmul.f32 %v1942_v58, %v871_v61  ;;  %vm889_vm4 = vweird.f32 %v1942_v58 }
 0x8f3   :  { %vm890_vm6 = vmor %vm888_vm5, %vm889_vm4 }
 0x8f4   :  { %v884_v4 = vmul.f32 %v1942_v58, %v883_v1 }
 0x8f6   :  { %v885_v5 = vmul.f32 0.5, %v884_v4 }
 0x8f8   :  { %v886_v8 = vsub.f32 1.5, %v885_v5  ;;  %v1992_v5 = vld [vmem:[#allocation5 + $0x8] sm:$0xff] }
 0x8fa   :  { %v887_v9 = vmul.f32 %v1942_v58, %v886_v8 }
 0x8fc   :  { %v891_v12 = vsel %vm890_vm6, %v1942_v58, %v887_v9 }
 0x8fd   :  { %v893_v13 = vmul.f32 %v891_v12, %v859_v42 }
 0x8ff   :  { %v896_v14 = vmul.f32 %v894_v63, %v893_v13  ;;  %v1991_v63 = vld [vmem:[#allocation5] sm:$0xff] }
 0x901   :  { %v899_v15 = vadd.f32 %v897_v3, %v896_v14 }
 0x903   :  { %v903_v16 = vand.u32 2147483647, %v899_v15  ;;  %vm901_vm14 = vcmp.ne.f32.partialorder %v899_v15, %v899_v15  ;;  %v1766_v35 = vclamps-f32 %v899_v15, 3.4028235e+38 }
 0x905   :  { %vm905_vm15 = vcmp.eq.f32.partialorder %v903_v16, inf }
 0x906   :  { %vm907_vm1 = vmor %vm901_vm14, %vm905_vm15 }
 0x907   :  { %v909_v18 = vsel %vm907_vm1, 1.0, %v2141_v53 }
 0x908   :  { %v911_v20 = vsel %vm97_vm0, %v909_v18, -inf }
 0x909   :  { %v912_v21 = vmax.f32 %v910_v19, %v911_v20 }
 0x90b   :  { %913 = vmax.xlane.f32.xlu2 %v912_v21 }
 0x97e   :  { %v914_v22 = vpop.xlane.xlu2 %913 }
 0x97f   :  { %v915_v23 = vrot.slane %v914_v22, 4 }
 0x981   :  { %v916_v24 = vmax.f32 %v914_v22, %v915_v23 }
 0x983   :  { %v917_v25 = vrot.slane %v916_v24, 2 }
 0x985   :  { %v918_v26 = vmax.f32 %v916_v24, %v917_v25 }
 0x987   :  { %v919_v27 = vrot.slane %v918_v26, 1 }
 0x989   :  { %v920_v28 = vmax.f32 %v918_v26, %v919_v27 }
 0x98b   :  { %1821 = vpush %v920_v28 }
 0x9bc   :  { %s1822_s27 = spop %1821 }
 0x9bd   :  { %p922_p0 = scmp.gt.f32.partialorder %s1822_s27, 0.5 }
 0x9bf   :  { %s927_s28 = scalar_select %p922_p0, 1, 0 }
 0x9c1   :  { %v928_v34 = vstv %s927_s28 }
 0x9c2   :  { %vm929_vm2 = vcmp.eq.s32.totalorder %v928_v34, 1 }
 0x9c3   :  { %v2437_v47 = vsel %vm929_vm2, %v1765_v59, %v898_v6  ;;  %v2441_v36 = vsel %vm929_vm2, %v1766_v35, %v899_v15 }
 0x9c4   :  { %1787 = vmatmul.msk.f32.vlgmr.msrb.gmra.mxu2 %vm97_vm0, %v2437_v47 }
 0x9cc   :  { %1788 = vmatmul.msk.f32.gmra.mxu2 %vm97_vm0, %v2441_v36 }
 0xa47   :  { %v982_v38 = vpop.f32.mrf.mxu2 }
 0xa48   :  { %v983_v30 = vadd.f32 %v982_v38, %v958_v52 }
 0xa4a   :  { %1090 = vrot.lane.b32.xlu0 %v983_v30, %s2128_s9  ;;  %v988_v39 = vmul.f32 0.35355338, %v983_v30 }
 0xa4c   :  { %1086 = vrot.lane.b32.xlu2 %v988_v39, %s2133_s16 }
 0xa4f   :  { %v985_v40 = vpop.f32.mrf.mxu2 }
 0xa50   :  { %v986_v41 = vadd.f32 %v985_v40, %v958_v52 }
 0xa52   :  { %1092 = vrot.lane.b32.xlu1 %v986_v41, %s2128_s9  ;;  %994 = vrot.lane.b32.xlu0 %v986_v41, %s2130_s11  ;;  %v989_v57 = vmul.f32 0.35355338, %v986_v41  ;;  %v2452_v42 = vpack.i.bf16 %v983_v30, %v986_v41 }
 0xa54   :  { %1088 = vrot.lane.b32.xlu2 %v989_v57, %s2133_s16  ;;  %s2142_s16 = smov [#allocation10]  }
 0xa5a   :  { %992 = vrot.lane.b32.xlu1 %v983_v30, %s2130_s11  ;;  %1284 = vrot.lane.b32.xlu0 %v986_v41, %s2132_s15 }
 0xa5c   :  { %1278 = vrot.lane.b32.xlu2 %v988_v39, %s2134_s17 }
 0xa62   :  { %1282 = vrot.lane.b32.xlu1 %v983_v30, %s2132_s15  ;;  %1188 = vrot.lane.b32.xlu0 %v986_v41, %s2129_s10 }
 0xa64   :  { %1280 = vrot.lane.b32.xlu2 %v989_v57, %s2134_s17  ;;  %s1716_s17 = sshll.u32 %s2142_s16, 4  ;;  %s1717_s17 = int_to_ptr.vmem [resolvable:$true] %s1716_s17 }
 0xa6a   :  { %1186 = vrot.lane.b32.xlu1 %v983_v30, %s2129_s10  ;;  %1182 = vrot.lane.b32.xlu0 %v988_v39, %s2131_s12 }
 0xa72   :  { %1184 = vrot.lane.b32.xlu1 %v989_v57, %s2131_s12 }
 0xaa6   :  { %v1087_v45 = vpop.permute.xlu2 %1086 }
 0xaae   :  { %v1089_v49 = vpop.permute.xlu2 %1088 }
 0xab6   :  { %v1279_v54 = vpop.permute.xlu2 %1278 }
 0xabc   :  { %v1091_v43 = vpop.permute.xlu0 %1090 }
 0xabe   :  { %v1281_v60 = vpop.permute.xlu2 %1280 }
 0xac4   :  { %v1093_v44 = vpop.permute.xlu1 %1092  ;;  %v995_v7 = vpop.permute.xlu0 %994 }
 0xac5   :  { %1789 = vmatpush.xpose.msk.msrb.mxu0 %vm214_vm8, %v995_v7  ;;  %1795 = vmatpush.xpose.msk.msrb.mxu3 %vm214_vm8, %v1093_v44 }
 0xac9   :  { %1796 = vmatpush.xpose.msk.msrb.mxu3 %vm214_vm8, %v1091_v43 }
 0xacc   :  { %v993_v46 = vpop.permute.xlu1 %992  ;;  %v1285_v48 = vpop.permute.xlu0 %1284  ;;  %1797 = vmatmul.msk.f32.vlgmr.msrb.gmra.mxu3 %vm214_vm8, %v1087_v45 }
 0xacd   :  { %1790 = vmatpush.xpose.msk.msrb.mxu0 %vm214_vm8, %v993_v46  ;;  %1807 = vmatpush.xpose.msk.msra.mxu3 %vm214_vm8, %v1285_v48 }
 0xad0   :  { %1791 = vmatmul.msk.f32.vlgmr.msrb.gmra.mxu0 %vm214_vm8, %v988_v39 }
 0xad4   :  { %v1283_v50 = vpop.permute.xlu1 %1282  ;;  %v1189_v51 = vpop.permute.xlu0 %1188  ;;  %1798 = vmatmul.msk.f32.gmra.mxu3 %vm214_vm8, %v1089_v49 }
 0xad5   :  { %1801 = vmatpush.xpose.msk.msra.mxu0 %vm214_vm8, %v1189_v51  ;;  %1808 = vmatpush.xpose.msk.msra.mxu3 %vm214_vm8, %v1283_v50 }
 0xad8   :  { %1792 = vmatmul.msk.f32.gmra.mxu0 %vm214_vm8, %v989_v57 }
 0xadc   :  { %v1187_v55 = vpop.permute.xlu1 %1186  ;;  %1809 = vmatmul.msk.f32.vlgmr.msra.gmra.mxu3 %vm214_vm8, %v1279_v54  ;;  %v1183_v56 = vpop.permute.xlu0 %1182 }
 0xadd   :  { %1802 = vmatpush.xpose.msk.msra.mxu0 %vm214_vm8, %v1187_v55 }
 0xae0   :  { %1803 = vmatmul.msk.f32.vlgmr.msra.gmra.mxu0 %vm214_vm8, %v1183_v56 }
 0xae4   :  { %1810 = vmatmul.msk.f32.gmra.mxu3 %vm214_vm8, %v1281_v60  ;;  %v1185_v61 = vpop.permute.xlu1 %1184 }
 0xae8   :  { %1804 = vmatmul.msk.f32.gmra.mxu0 %vm214_vm8, %v1185_v61 }
 0xb4d   :  { %v1023_v62 = vpop.f32.mrf.mxu0 }
 0xb4e   :  { %v1024_v0 = vadd.f32 %v1991_v63, %v1023_v62 }
 0xb4f   :  { %v1119_v58 = vpop.f32.mrf.mxu3 }
 0xb50   :  { %v1120_v1 = vadd.f32 %v1991_v63, %v1119_v58  ;;  %v1029_v2 = vsel %vm248_vm9, %v1024_v0, -inf }
 0xb51   :  { %1030 = vmax.xlane.f32.xlu0 %v1029_v2 }
 0xb52   :  { %v1125_v3 = vsel %vm248_vm9, %v1120_v1, -inf }
 0xb53   :  { %1126 = vmax.xlane.f32.xlu2 %v1125_v3 }
 0xb55   :  { %v1026_v4 = vpop.f32.mrf.mxu0 }
 0xb56   :  { %v1027_v6 = vadd.f32 %v1992_v5, %v1026_v4 }
 0xb57   :  { %v1122_v8 = vpop.f32.mrf.mxu3 }
 0xb58   :  { %v1123_v9 = vadd.f32 %v1992_v5, %v1122_v8  ;;  %v1032_v12 = vsel %vm248_vm9, %v1027_v6, -inf }
 0xb5a   :  { %v1128_v11 = vsel %vm248_vm9, %v1123_v9, -inf }
 0xb5b   :  { %1129 = vmax.xlane.f32.xlu1 %v1128_v11  ;;  %1033 = vmax.xlane.f32.xlu2 %v1032_v12 }
 0xb5d   :  { %v1215_v13 = vpop.f32.mrf.mxu0 }
 0xb5e   :  { %v1216_v14 = vadd.f32 %v1991_v63, %v1215_v13 }
 0xb5f   :  { %v1311_v15 = vpop.f32.mrf.mxu3 }
 0xb60   :  { %v1312_v16 = vadd.f32 %v1991_v63, %v1311_v15  ;;  %v1221_v17 = vsel %vm248_vm9, %v1216_v14, -inf }
 0xb62   :  { %v1317_v18 = vsel %vm248_vm9, %v1312_v16, -inf }
 0xb63   :  { %1222 = vmax.xlane.f32.xlu1 %v1221_v17  ;;  %1318 = vmax.xlane.f32.xlu0 %v1317_v18 }
 0xb65   :  { %v1218_v19 = vpop.f32.mrf.mxu0 }
 0xb66   :  { %v2486_v20 = vadd.f32 %v1992_v5, %v1218_v19 }
 0xb67   :  { %v1314_v21 = vpop.f32.mrf.mxu3 }
 0xb68   :  { %v1315_v22 = vadd.f32 %v1992_v5, %v1314_v21  ;;  %v1224_v24 = vsel %vm248_vm9, %v2486_v20, -inf }
 0xb6a   :  { %v1320_v23 = vsel %vm248_vm9, %v1315_v22, -inf }
 0xb6b   :  { %1321 = vmax.xlane.f32.xlu2 %v1320_v23  ;;  %1225 = vmax.xlane.f32.xlu0 %v1224_v24 }
 0xb7f   :  { %1868 = vrot.lane.b32.xlu0 %v2452_v42, %s2136_s1  ;;  %s1718_s1 = sshll.u32 %s2655_s8, 4  ;;  %s1719_s1 = int_to_ptr.hbm [resolvable:$true] %s1718_s1 }
 0xbc4   :  { %v1031_v25 = vpop.xlane.xlu0 %1030 }
 0xbc5   :  { %v1035_v26 = vsub.f32 %v1024_v0, %v1031_v25 }
 0xbc6   :  { %v1127_v27 = vpop.xlane.xlu2 %1126 }
 0xbc7   :  { %v1037_v28 = vmul.f32 1.442695, %v1035_v26  ;;  %v1131_v29 = vsub.f32 %v1120_v1, %v1127_v27 }
 0xbc9   :  { %1943 = vpow2.f32 %v1037_v28  ;;  %v1133_v31 = vmul.f32 1.442695, %v1131_v29 }
 0xbcb   :  { %1945 = vpow2.f32 %v1133_v31 }
 0xbce   :  { %v1130_v32 = vpop.xlane.xlu1 %1129  ;;  %v1034_v33 = vpop.xlane.xlu2 %1033 }
 0xbcf   :  { %v2493_v59 = vpop.eup %1943  ;;  %v1036_v34 = vsub.f32 %v1027_v6, %v1034_v33  ;;  %v1132_v30 = vsub.f32 %v1123_v9, %v1130_v32 }
 0xbd0   :  { %v1041_v35 = vsel %vm248_vm9, %v2493_v59, 0.0 }
 0xbd1   :  { %v1946_v52 = vpop.eup %1945  ;;  %v1039_v38 = vmul.f32 1.442695, %v1036_v34  ;;  %1042 = vadd.xlane.f32.xlu2 %v1041_v35  ;;  %v1135_v40 = vmul.f32 1.442695, %v1132_v30 }
 0xbd2   :  { %v1137_v39 = vsel %vm248_vm9, %v1946_v52, 0.0 }
 0xbd3   :  { %1138 = vadd.xlane.f32.xlu1 %v1137_v39  ;;  %1947 = vpow2.f32 %v1039_v38 }
 0xbd4   :  { %1949 = vpow2.f32 %v1135_v40 }
 0xbd6   :  { %v1319_v41 = vpop.xlane.xlu0 %1318  ;;  %v1223_v57 = vpop.xlane.xlu1 %1222 }
 0xbd7   :  { %v1323_v43 = vsub.f32 %v1312_v16, %v1319_v41  ;;  %v1227_v45 = vsub.f32 %v1216_v14, %v1223_v57 }
 0xbd9   :  { %v1325_v44 = vmul.f32 1.442695, %v1323_v43  ;;  %v1948_v7 = vpop.eup %1947  ;;  %v1229_v48 = vmul.f32 1.442695, %v1227_v45 }
 0xbda   :  { %v1044_v46 = vsel %vm248_vm9, %v1948_v7, 0.0  ;;  %v1950_v49 = vpop.eup %1949 }
 0xbdb   :  { %1951 = vpow2.f32 %v1325_v44  ;;  %1045 = vadd.xlane.f32.xlu1 %v1044_v46  ;;  %v1140_v51 = vsel %vm248_vm9, %v1950_v49, 0.0 }
 0xbdc   :  { %1953 = vpow2.f32 %v1229_v48 }
 0xbde   :  { %v1226_v56 = vpop.xlane.xlu0 %1225  ;;  %v1322_v0 = vpop.xlane.xlu2 %1321 }
 0xbdf   :  { %v1324_v58 = vsub.f32 %v1315_v22, %v1322_v0  ;;  %v1228_v4 = vsub.f32 %v2486_v20, %v1226_v56 }
 0xbe1   :  { %v2499_v50 = vpop.eup %1951  ;;  %v1327_v1 = vmul.f32 1.442695, %v1324_v58  ;;  %v1231_v5 = vmul.f32 1.442695, %v1228_v4 }
 0xbe2   :  { %v1329_v54 = vsel %vm248_vm9, %v2499_v50, 0.0  ;;  %v2504_v55 = vpop.eup %1953 }
 0xbe3   :  { %1141 = vadd.xlane.f32.xlu1 %v1140_v51  ;;  %1330 = vadd.xlane.f32.xlu0 %v1329_v54  ;;  %v1233_v60 = vsel %vm248_vm9, %v2504_v55, 0.0  ;;  %1955 = vpow2.f32 %v1327_v1  ;;  %v1773_v51 = vld [vmem:[%s2651_s4 + $0x30] sm:$0xff]  ;;  %v1772_v54 = vld [vmem:[%s2651_s4 + $0x28] sm:$0xff] }
 0xbe4   :  { %1957 = vpow2.f32 %v1231_v5 }
 0xbe9   :  { %1873 = vrot.lane.b32.xlu2 %v2452_v42, %s2135_s18  ;;  %v1956_v2 = vpop.eup %1955 }
 0xbea   :  { %v1332_v3 = vsel %vm248_vm9, %v1956_v2, 0.0  ;;  %v1958_v6 = vpop.eup %1957 }
 0xbeb   :  { %1234 = vadd.xlane.f32.xlu1 %v1233_v60  ;;  %v1236_v8 = vsel %vm248_vm9, %v1958_v6, 0.0 }
 0xbf1   :  { %v1869_v61 = vpop.permute.xlu0 %1868 }
 0xbf2   :  { %v1870_v62 = vunpack.i.l.bf16 %v1869_v61  ;;  %v1871_v63 = vunpack.i.h.bf16 %v1869_v61 }
 0xbf4   :  { %1173 = vmatpush.msra.mxu2 %v1870_v62 }
 0xbf6   :  { %1174 = vmatpush.msra.mxu2 %v1871_v63 }
 0xc04   :  { %1878 = vrot.lane.b32.xlu1 %v2452_v42, %s2137_s0 }
 0xc0c   :  { %1883 = vrot.lane.b32.xlu1 %v2452_v42, %s2138_s19 }
 0xc12   :  { %1333 = vadd.xlane.f32.xlu2 %v1332_v3 }
 0xc36   :  { %1237 = vadd.xlane.f32.xlu1 %v1236_v8 }
 0xc44   :  { %v1043_v9 = vpop.xlane.xlu2 %1042 }
 0xc45   :  { %1959 = vrcp.f32 %v1043_v9 }
 0xc46   :  { %v1139_v11 = vpop.xlane.xlu1 %1138 }
 0xc47   :  { %1961 = vrcp.f32 %v1139_v11 }
 0xc4b   :  { %v1960_v12 = vpop.eup %1959 }
 0xc4c   :  { %v1874_v13 = vpop.permute.xlu2 %1873  ;;  %v1049_v18 = vmul.f32 %v1960_v12, %v2493_v59 }
 0xc4d   :  { %v1962_v14 = vpop.eup %1961  ;;  %v1875_v42 = vunpack.i.l.bf16 %v1874_v13  ;;  %v1876_v16 = vunpack.i.h.bf16 %v1874_v13 }
 0xc4e   :  { %v1145_v15 = vmul.f32 %v1962_v14, %v1946_v52  ;;  %v1046_v17 = vpop.xlane.xlu1 %1045 }
 0xc4f   :  { %1077 = vmatpush.msrb.mxu1 %v1875_v42  ;;  %1963 = vrcp.f32 %v1046_v17 }
 0xc50   :  { %1799 = vmatmul.msk.f32.vlgmr.msra.gmra.mxu2 %vm248_vm9, %v1145_v15 }
 0xc51   :  { %1078 = vmatpush.msrb.mxu1 %v1876_v16 }
 0xc52   :  { %1793 = vmatmul.msk.f32.vlgmr.msrb.gmra.mxu1 %vm248_vm9, %v1049_v18 }
 0xc55   :  { %v1964_v19 = vpop.eup %1963 }
 0xc56   :  { %v1142_v20 = vpop.xlane.xlu1 %1141  ;;  %v1050_v21 = vmul.f32 %v1964_v19, %v1948_v7  ;;  %v1331_v24 = vpop.xlane.xlu0 %1330 }
 0xc57   :  { %1965 = vrcp.f32 %v1142_v20 }
 0xc58   :  { %1967 = vrcp.f32 %v1331_v24 }
 0xc5a   :  { %1794 = vmatmul.msk.f32.gmra.mxu1 %vm248_vm9, %v1050_v21 }
 0xc5d   :  { %v1966_v22 = vpop.eup %1965 }
 0xc5e   :  { %v1146_v23 = vmul.f32 %v1966_v22, %v1950_v49  ;;  %v1235_v25 = vpop.xlane.xlu1 %1234  ;;  %v1968_v27 = vpop.eup %1967 }
 0xc5f   :  { %1969 = vrcp.f32 %v1235_v25  ;;  %v1337_v31 = vmul.f32 %v1968_v27, %v2499_v50  ;;  %v1774_v50 = vld [vmem:[%s2651_s4 + $0x38] sm:$0xff]  ;;  %v1777_v25 = vld [vmem:[%s2652_s5 + $0x30] sm:$0xff]  ;;  %v1775_v27 = vld [vmem:[%s2652_s5 + $0x20] sm:$0xff] }
 0xc60   :  { %1800 = vmatmul.msk.f32.gmra.mxu2 %vm248_vm9, %v1146_v23  ;;  %1423 = vmatpush.msrb.mxu0 %v1774_v50 }
 0xc62   :  { %1424 = vmatpush.msrb.mxu0 %v1773_v51 }
 0xc64   :  { %1425 = vmatpush.msrb.mxu0 %v1772_v54 }
 0xc65   :  { %v1970_v33 = vpop.eup %1969 }
 0xc66   :  { %v1241_v35 = vmul.f32 %v1970_v33, %v2504_v55  ;;  %v1771_v55 = vld [vmem:[%s2651_s4 + $0x20] sm:$0xff] }
 0xc67   :  { %1426 = vmatpush.msrb.mxu0 %v1771_v55 }
 0xc76   :  { %v1879_v26 = vpop.permute.xlu1 %1878 }
 0xc77   :  { %v1880_v28 = vunpack.i.l.bf16 %v1879_v26  ;;  %v1881_v29 = vunpack.i.h.bf16 %v1879_v26  ;;  %v1776_v26 = vld [vmem:[%s2652_s5 + $0x28] sm:$0xff] }
 0xc79   :  { %1365 = vmatpush.msrb.mxu2 %v1880_v28 }
 0xc7b   :  { %1366 = vmatpush.msrb.mxu2 %v1881_v29 }
 0xc7c   :  { %1811 = vmatmul.msk.f32.vlgmr.msrb.gmra.mxu2 %vm248_vm9, %v1337_v31 }
 0xc7e   :  { %v1884_v32 = vpop.permute.xlu1 %1883 }
 0xc7f   :  { %v1885_v59 = vunpack.i.l.bf16 %v1884_v32  ;;  %v1886_v34 = vunpack.i.h.bf16 %v1884_v32 }
 0xc81   :  { %1269 = vmatpush.msra.mxu1 %v1885_v59 }
 0xc83   :  { %1270 = vmatpush.msra.mxu1 %v1886_v34 }
 0xc84   :  { %1805 = vmatmul.msk.f32.vlgmr.msra.gmra.mxu1 %vm248_vm9, %v1241_v35 }
 0xc85   :  { %v1334_v52 = vpop.xlane.xlu2 %1333 }
 0xc86   :  { %1971 = vrcp.f32 %v1334_v52 }
 0xc8c   :  { %v1972_v38 = vpop.eup %1971 }
 0xc8d   :  { %v1338_v30 = vmul.f32 %v1972_v38, %v1956_v2  ;;  %v1480_v38 = vperm.slane %v2445_v37, 4 }
 0xc8f   :  { %1812 = vmatmul.msk.f32.gmra.mxu2 %vm248_vm9, %v1338_v30 }
 0xca9   :  { %v1238_v39 = vpop.xlane.xlu1 %1237 }
 0xcaa   :  { %1973 = vrcp.f32 %v1238_v39 }
 0xcb0   :  { %v1974_v40 = vpop.eup %1973 }
 0xcb1   :  { %v1242_v41 = vmul.f32 %v1974_v40, %v1958_v6  ;;  %v1404_v6 = vperm.slane %v2445_v37, 1  ;;  %v1483_v40 = vperm.slane %v2445_v37, 5 }
 0xcb3   :  { %1806 = vmatmul.msk.f32.gmra.mxu1 %vm248_vm9, %v1242_v41 }
 0xccf   :  { %v1080_v44 = vpop.f32.mrf.mxu1 }
 0xcd3   :  { %v1176_v57 = vpop.f32.mrf.mxu2 }
 0xcd4   :  { %1376 = vrot.lane.b32.xlu0 %v1176_v57, %s2123_s14 }
 0xcd7   :  { %v1083_v7 = vpop.f32.mrf.mxu1 }
 0xce3   :  { %v1179_v43 = vpop.f32.mrf.mxu2 }
 0xce4   :  { %1378 = vrot.lane.b32.xlu0 %v1179_v43, %s2123_s14 }
 0xcff   :  { %v1368_v45 = vpop.f32.mrf.mxu2 }
 0xd00   :  { %1392 = vrot.lane.b32.xlu0 %v1368_v45, %s2139_s20 }
 0xd01   :  { %v1272_v46 = vpop.f32.mrf.mxu1 }
 0xd02   :  { %1384 = vrot.lane.b32.xlu2 %v1272_v46, %s2140_s21 }
 0xd12   :  { %v1371_v48 = vpop.f32.mrf.mxu2 }
 0xd13   :  { %1394 = vrot.lane.b32.xlu0 %v1371_v48, %s2139_s20 }
 0xd30   :  { %v1275_v49 = vpop.f32.mrf.mxu1 }
 0xd31   :  { %1386 = vrot.lane.b32.xlu2 %v1275_v49, %s2140_s21 }
 0xd46   :  { %v1377_v56 = vpop.permute.xlu0 %1376 }
 0xd47   :  { %v1398_v62 = vsel %vm214_vm8, %v1080_v44, %v1377_v56 }
 0xd56   :  { %v1379_v60 = vpop.permute.xlu0 %1378 }
 0xd57   :  { %v1399_v1 = vsel %vm214_vm8, %v1083_v7, %v1379_v60 }
 0xd5c   :  { %v1385_v61 = vpop.permute.xlu2 %1384 }
 0xd5d   :  { %v1400_v63 = vsel %vm248_vm9, %v1398_v62, %v1385_v61  ;;  %v1486_v61 = vperm.slane %v2445_v37, 2 }
 0xd72   :  { %v1393_v0 = vpop.permute.xlu0 %1392 }
 0xd73   :  { %v1402_v58 = vsel %vm622_vm10, %v1400_v63, %v1393_v0 }
 0xd74   :  { %1813 = vmatmul.msk.f32.vlgmr.msrb.gmra.mxu0 %vm97_vm0, %v1402_v58 }
 0xd85   :  { %v1395_v3 = vpop.permute.xlu0 %1394 }
 0xd8b   :  { %v1387_v2 = vpop.permute.xlu2 %1386 }
 0xd8c   :  { %v1401_v4 = vsel %vm248_vm9, %v1399_v1, %v1387_v2 }
 0xd8d   :  { %v1403_v5 = vsel %vm622_vm10, %v1401_v4, %v1395_v3  ;;  %v1786_v3 = vld [vmem:[%s2653_s6 + $0x78] sm:$0xff]  ;;  %v1785_v4 = vld [vmem:[%s2653_s6 + $0x70] sm:$0xff] }
 0xd8e   :  { %1814 = vmatmul.msk.f32.gmra.mxu0 %vm97_vm0, %v1403_v5  ;;  %1611 = vmatpush.msrb.mxu3 %v1786_v3  ;;  %v1784_v5 = vld [vmem:[%s2653_s6 + $0x68] sm:$0xff] }
 0xd90   :  { %1612 = vmatpush.msrb.mxu3 %v1785_v4 }
 0xd92   :  { %1613 = vmatpush.msrb.mxu3 %v1784_v5 }
 0xdf1   :  { %v1428_v8 = vpop.f32.mrf.mxu0 }
 0xdf2   :  { %v1429_v9 = vadd.f32 %v1428_v8, %v1404_v6 }
 0xdf4   :  { %v1434_v11 = vadd.f32 %v1429_v9, %v2437_v47 }
 0xdf6   :  { %v1436_v12 = vsel %vm97_vm0, %v1434_v11, 0.0 }
 0xdf7   :  { %1437 = vadd.xlane.f32.xlu2 %v1436_v12 }
 0xe0b   :  { %v1431_v13 = vpop.f32.mrf.mxu0 }
 0xe0c   :  { %v1432_v14 = vadd.f32 %v1431_v13, %v1404_v6  ;;  %v1783_v6 = vld [vmem:[%s2653_s6 + $0x60] sm:$0xff]  ;;  %v1781_v13 = vld [vmem:[%s2653_s6 + $0x50] sm:$0xff] }
 0xe0d   :  { %1614 = vmatpush.msrb.mxu3 %v1783_v6 }
 0xe0e   :  { %v1435_v42 = vadd.f32 %v1432_v14, %v2441_v36  ;;  %v1778_v36 = vld [vmem:[%s2652_s5 + $0x38] sm:$0xff] }
 0xe0f   :  { %1505 = vmatpush.msrb.mxu1 %v1778_v36 }
 0xe10   :  { %v1439_v15 = vsel %vm97_vm0, %v1435_v42, 0.0 }
 0xe11   :  { %1440 = vadd.xlane.f32.xlu1 %v1439_v15  ;;  %1506 = vmatpush.msrb.mxu1 %v1777_v25 }
 0xe13   :  { %1507 = vmatpush.msrb.mxu1 %v1776_v26 }
 0xe15   :  { %1508 = vmatpush.msrb.mxu1 %v1775_v27 }
 0xe6a   :  { %v1438_v16 = vpop.xlane.xlu2 %1437 }
 0xe6b   :  { %v1442_v17 = vmul.f32 %v1438_v16, %v2211_v10  ;;  %v1780_v16 = vld [vmem:[%s2653_s6 + $0x48] sm:$0xff] }
 0xe6d   :  { %v1444_v18 = vsub.f32 %v1434_v11, %v1442_v17  ;;  %v1782_v11 = vld [vmem:[%s2653_s6 + $0x58] sm:$0xff]  ;;  %v1779_v17 = vld [vmem:[%s2653_s6 + $0x40] sm:$0xff] }
 0xe6e   :  { %1615 = vmatpush.msrb.mxu3 %v1782_v11 }
 0xe6f   :  { %v1446_v19 = vmul.f32 %v1444_v18, %v1444_v18 }
 0xe70   :  { %1616 = vmatpush.msrb.mxu3 %v1781_v13 }
 0xe71   :  { %v1448_v20 = vsel %vm97_vm0, %v1446_v19, 0.0 }
 0xe72   :  { %1449 = vadd.xlane.f32.xlu0 %v1448_v20  ;;  %1617 = vmatpush.msrb.mxu3 %v1780_v16 }
 0xe74   :  { %1618 = vmatpush.msrb.mxu3 %v1779_v17 }
 0xe84   :  { %v1441_v21 = vpop.xlane.xlu1 %1440 }
 0xe85   :  { %v1443_v47 = vmul.f32 %v1441_v21, %v2211_v10 }
 0xe87   :  { %v1445_v22 = vsub.f32 %v1435_v42, %v1443_v47 }
 0xe89   :  { %v1447_v23 = vmul.f32 %v1445_v22, %v1445_v22 }
 0xe8b   :  { %v1451_v24 = vsel %vm97_vm0, %v1447_v23, 0.0 }
 0xe8c   :  { %1452 = vadd.xlane.f32.xlu1 %v1451_v24 }
 0xee5   :  { %v1450_v28 = vpop.xlane.xlu0 %1449 }
 0xee6   :  { %v1454_v29 = vmul.f32 %v1450_v28, %v2211_v10 }
 0xee8   :  { %v1456_v31 = vadd.f32 1e-05, %v1454_v29 }
 0xeea   :  { %1975 = vrsqrt.f32 %v1456_v31  ;;  %vm1464_vm9 = vweird.f32 %v1456_v31 }
 0xef0   :  { %v1976_v32 = vpop.eup %1975 }
 0xef1   :  { %v1459_v33 = vmul.f32 %v1976_v32, %v1456_v31  ;;  %vm1465_vm8 = vweird.f32 %v1976_v32 }
 0xef2   :  { %vm1466_vm10 = vmor %vm1464_vm9, %vm1465_vm8 }
 0xef3   :  { %v1460_v59 = vmul.f32 %v1976_v32, %v1459_v33 }
 0xef5   :  { %v1461_v34 = vmul.f32 0.5, %v1460_v59 }
 0xef7   :  { %v1462_v35 = vsub.f32 1.5, %v1461_v34 }
 0xef9   :  { %v1463_v52 = vmul.f32 %v1976_v32, %v1462_v35 }
 0xefb   :  { %v1467_v30 = vsel %vm1466_vm10, %v1976_v32, %v1463_v52 }
 0xefc   :  { %v1478_v39 = vmul.f32 %v1467_v30, %v1444_v18 }
 0xefe   :  { %v1481_v41 = vmul.f32 %v1480_v38, %v1478_v39 }
 0xeff   :  { %v1453_v57 = vpop.xlane.xlu1 %1452 }
 0xf00   :  { %v1455_v43 = vmul.f32 %v1453_v57, %v2211_v10  ;;  %v2579_v44 = vadd.f32 %v1483_v40, %v1481_v41 }
 0xf02   :  { %v1457_v7 = vadd.f32 1e-05, %v1455_v43  ;;  %1815 = vmatmul.msk.f32.vlgmr.msrb.gmra.mxu1 %vm97_vm0, %v2579_v44 }
 0xf04   :  { %1977 = vrsqrt.f32 %v1457_v7  ;;  %vm1474_vm4 = vweird.f32 %v1457_v7 }
 0xf0a   :  { %v1978_v45 = vpop.eup %1977 }
 0xf0b   :  { %v1469_v46 = vmul.f32 %v1978_v45, %v1457_v7  ;;  %vm1475_vm3 = vweird.f32 %v1978_v45 }
 0xf0c   :  { %vm1476_vm5 = vmor %vm1474_vm4, %vm1475_vm3 }
 0xf0d   :  { %v1470_v48 = vmul.f32 %v1978_v45, %v1469_v46 }
 0xf0f   :  { %v1471_v49 = vmul.f32 0.5, %v1470_v48 }
 0xf11   :  { %v1472_v50 = vsub.f32 1.5, %v1471_v49 }
 0xf13   :  { %v1473_v51 = vmul.f32 %v1978_v45, %v1472_v50 }
 0xf15   :  { %v1477_v54 = vsel %vm1476_vm5, %v1978_v45, %v1473_v51 }
 0xf16   :  { %v1479_v55 = vmul.f32 %v1477_v54, %v1445_v22 }
 0xf18   :  { %v1482_v56 = vmul.f32 %v1480_v38, %v1479_v55 }
 0xf1a   :  { %v2583_v60 = vadd.f32 %v1483_v40, %v1482_v56 }
 0xf1c   :  { %1816 = vmatmul.msk.f32.gmra.mxu1 %vm97_vm0, %v2583_v60 }
 0xf7f   :  { %v1510_v62 = vpop.f32.mrf.mxu1 }
 0xf80   :  { %v2588_v63 = vadd.f32 %v1510_v62, %v1486_v61 }
 0xf82   :  { %v2591_v0 = vmul.f32 0.70710677, %v2588_v63  ;;  %v1516_v55 = vmul.f32 0.5, %v2588_v63 }
 0xf84   :  { %v1520_v58 = vand.u32 2147483647, %v2591_v0  ;;  %vm1586_vm1 = vcmp.ge.f32.partialorder %v2591_v0, 0.0 }
 0xf86   :  { %v1522_v1 = vmul.f32 0.3275911, %v1520_v58  ;;  %v1574_v22 = vsub.f32 0.0, %v1520_v58 }
 0xf88   :  { %v1524_v2 = vadd.f32 1.0, %v1522_v1  ;;  %v1576_v26 = vmul.f32 %v1574_v22, %v1520_v58 }
 0xf8a   :  { %1979 = vrcp.f32 %v1524_v2  ;;  %v1537_v14 = vand.u32 2147483648, %v1524_v2  ;;  %v1535_v15 = vand.u32 2147483647, %v1524_v2  ;;  %vm1531_vm11 = vweird.f32 %v1524_v2 }
 0xf8b   :  { %v1578_v32 = vmul.f32 1.442695, %v1576_v26 }
 0xf8c   :  { %v1538_v19 = vor.u32 1.1754944e-38, %v1537_v14  ;;  %vm1536_vm13 = vcmp.eq.f32.partialorder %v1535_v15, 8.507059e+37 }
 0xf90   :  { %v1980_v8 = vpop.eup %1979 }
 0xf91   :  { %v1527_v9 = vmul.f32 %v1980_v8, %v1524_v2  ;;  %vm1532_vm6 = vweird.f32 %v1980_v8 }
 0xf92   :  { %vm1533_vm12 = vmor %vm1531_vm11, %vm1532_vm6 }
 0xf93   :  { %v1528_v12 = vsub.f32 1.0, %v1527_v9 }
 0xf95   :  { %v1529_v42 = vmul.f32 %v1980_v8, %v1528_v12 }
 0xf97   :  { %v1530_v18 = vadd.f32 %v1980_v8, %v1529_v42 }
 0xf99   :  { %v1534_v20 = vsel %vm1533_vm12, %v1980_v8, %v1530_v18  ;;  %v1513_v21 = vpop.f32.mrf.mxu1 }
 0xf9a   :  { %v1539_v47 = vsel %vm1536_vm13, %v1538_v19, %v1534_v20  ;;  %v1514_v23 = vadd.f32 %v1513_v21, %v1486_v61  ;;  %v1596_v19 = vperm.slane %v2445_v37, 3 }
 0xf9b   :  { %v1556_v24 = vmul.f32 1.0614054, %v1539_v47 }
 0xf9c   :  { %v1519_v36 = vmul.f32 0.70710677, %v1514_v23  ;;  %v1517_v16 = vmul.f32 0.5, %v1514_v23 }
 0xf9d   :  { %v1558_v25 = vadd.f32 -1.4531521, %v1556_v24 }
 0xf9e   :  { %v1521_v27 = vand.u32 2147483647, %v1519_v36  ;;  %vm1587_vm9 = vcmp.ge.f32.partialorder %v1519_v36, 0.0 }
 0xf9f   :  { %v1560_v28 = vmul.f32 %v1558_v25, %v1539_v47 }
 0xfa0   :  { %v1523_v29 = vmul.f32 0.3275911, %v1521_v27  ;;  %v1575_v61 = vsub.f32 0.0, %v1521_v27 }
 0xfa1   :  { %v1562_v31 = vadd.f32 1.4214138, %v1560_v28 }
 0xfa2   :  { %v1525_v33 = vadd.f32 1.0, %v1523_v29  ;;  %v1577_v3 = vmul.f32 %v1575_v61, %v1521_v27 }
 0xfa3   :  { %v1564_v59 = vmul.f32 %v1562_v31, %v1539_v47 }
 0xfa4   :  { %1981 = vrcp.f32 %v1525_v33  ;;  %v1552_v43 = vand.u32 2147483648, %v1525_v33  ;;  %v1550_v46 = vand.u32 2147483647, %v1525_v33  ;;  %vm1546_vm15 = vweird.f32 %v1525_v33 }
 0xfa5   :  { %v1566_v34 = vadd.f32 -0.28449672, %v1564_v59  ;;  %1983 = vpow2.f32 %v1578_v32  ;;  %v1580_v6 = vmul.f32 1.442695, %v1577_v3 }
 0xfa6   :  { %v1553_v50 = vor.u32 1.1754944e-38, %v1552_v43  ;;  %vm1551_vm8 = vcmp.eq.f32.partialorder %v1550_v46, 8.507059e+37 }
 0xfa7   :  { %v1568_v35 = vmul.f32 %v1566_v34, %v1539_v47  ;;  %1985 = vpow2.f32 %v1580_v6 }
 0xfa9   :  { %v1570_v52 = vadd.f32 0.2548296, %v1568_v35 }
 0xfaa   :  { %v1982_v38 = vpop.eup %1981 }
 0xfab   :  { %v1572_v30 = vmul.f32 %v1570_v52, %v1539_v47  ;;  %v1542_v39 = vmul.f32 %v1982_v38, %v1525_v33  ;;  %v1984_v40 = vpop.eup %1983  ;;  %vm1547_vm14 = vweird.f32 %v1982_v38 }
 0xfac   :  { %vm1548_vm2 = vmor %vm1546_vm15, %vm1547_vm14 }
 0xfad   :  { %v1582_v41 = vmul.f32 %v1984_v40, %v1572_v30  ;;  %v1543_v57 = vsub.f32 1.0, %v1542_v39  ;;  %v1986_v13 = vpop.eup %1985 }
 0xfaf   :  { %v1584_v7 = vsub.f32 1.0, %v1582_v41  ;;  %v1544_v45 = vmul.f32 %v1982_v38, %v1543_v57 }
 0xfb1   :  { %v1588_v48 = vsub.f32 0.0, %v1584_v7  ;;  %v1545_v49 = vadd.f32 %v1982_v38, %v1544_v45 }
 0xfb3   :  { %v1590_v51 = vsel %vm1586_vm1, %v1584_v7, %v1588_v48  ;;  %v1549_v54 = vsel %vm1548_vm2, %v1982_v38, %v1545_v49  ;;  %v1672_v48 = vperm.slane %v2445_v37, 6 }
 0xfb4   :  { %v1592_v56 = vadd.f32 1.0, %v1590_v51  ;;  %v1554_v62 = vsel %vm1551_vm8, %v1553_v50, %v1549_v54 }
 0xfb5   :  { %v1557_v58 = vmul.f32 1.0614054, %v1554_v62 }
 0xfb6   :  { %v1594_v1 = vmul.f32 %v1592_v56, %v1516_v55  ;;  %v1675_v55 = vperm.slane %v2445_v37, 7 }
 0xfb7   :  { %v1559_v2 = vadd.f32 -1.4531521, %v1557_v58 }
 0xfb8   :  { %1817 = vmatmul.msk.f32.vlgmr.msrb.gmra.mxu3 %vm818_vm7, %v1594_v1 }
 0xfb9   :  { %v1561_v4 = vmul.f32 %v1559_v2, %v1554_v62 }
 0xfbb   :  { %v1563_v5 = vadd.f32 1.4214138, %v1561_v4 }
 0xfbd   :  { %v1565_v0 = vmul.f32 %v1563_v5, %v1554_v62 }
 0xfbf   :  { %v1567_v8 = vadd.f32 -0.28449672, %v1565_v0 }
 0xfc1   :  { %v1569_v9 = vmul.f32 %v1567_v8, %v1554_v62 }
 0xfc3   :  { %v1571_v11 = vadd.f32 0.2548296, %v1569_v9 }
 0xfc5   :  { %v1573_v12 = vmul.f32 %v1571_v11, %v1554_v62 }
 0xfc7   :  { %v1583_v63 = vmul.f32 %v1986_v13, %v1573_v12 }
 0xfc9   :  { %v1585_v14 = vsub.f32 1.0, %v1583_v63 }
 0xfcb   :  { %v1589_v42 = vsub.f32 0.0, %v1585_v14 }
 0xfcd   :  { %v1591_v15 = vsel %vm1587_vm9, %v1585_v14, %v1589_v42 }
 0xfce   :  { %v1593_v17 = vadd.f32 1.0, %v1591_v15 }
 0xfd0   :  { %v1595_v18 = vmul.f32 %v1593_v17, %v1517_v16 }
 0xfd2   :  { %1818 = vmatmul.msk.f32.gmra.mxu3 %vm818_vm7, %v1595_v18 }
0x103b   :  { %v1620_v20 = vpop.f32.mrf.mxu3 }
0x103c   :  { %v1621_v21 = vadd.f32 %v1620_v20, %v1596_v19 }
0x103e   :  { %v1626_v47 = vadd.f32 %v1621_v21, %v2579_v44 }
0x1040   :  { %v1628_v22 = vsel %vm97_vm0, %v1626_v47, 0.0 }
0x1041   :  { %1629 = vadd.xlane.f32.xlu1 %v1628_v22 }
0x1055   :  { %v1623_v24 = vpop.f32.mrf.mxu3 }
0x1056   :  { %v1624_v25 = vadd.f32 %v1623_v24, %v1596_v19 }
0x1058   :  { %v1627_v26 = vadd.f32 %v1624_v25, %v2583_v60 }
0x105a   :  { %v1631_v36 = vsel %vm97_vm0, %v1627_v26, 0.0 }
0x105b   :  { %1632 = vadd.xlane.f32.xlu1 %v1631_v36 }
0x10b4   :  { %v1630_v23 = vpop.xlane.xlu1 %1629 }
0x10b5   :  { %v1634_v27 = vmul.f32 %v1630_v23, %v2211_v10 }
0x10b7   :  { %v1636_v28 = vsub.f32 %v1626_v47, %v1634_v27 }
0x10b9   :  { %v1638_v29 = vmul.f32 %v1636_v28, %v1636_v28 }
0x10bb   :  { %v1640_v31 = vsel %vm97_vm0, %v1638_v29, 0.0 }
0x10bc   :  { %1641 = vadd.xlane.f32.xlu1 %v1640_v31 }
0x10ce   :  { %v1633_v32 = vpop.xlane.xlu1 %1632 }
0x10cf   :  { %v1635_v44 = vmul.f32 %v1633_v32, %v2211_v10 }
0x10d1   :  { %v1637_v33 = vsub.f32 %v1627_v26, %v1635_v44 }
0x10d3   :  { %v1639_v59 = vmul.f32 %v1637_v33, %v1637_v33 }
0x10d5   :  { %v1643_v34 = vsel %vm97_vm0, %v1639_v59, 0.0 }
0x10d6   :  { %1644 = vadd.xlane.f32.xlu2 %v1643_v34 }
0x112f   :  { %v1642_v60 = vpop.xlane.xlu1 %1641 }
0x1130   :  { %v1646_v35 = vmul.f32 %v1642_v60, %v2211_v10 }
0x1132   :  { %v1648_v52 = vadd.f32 1e-05, %v1646_v35 }
0x1134   :  { %1987 = vrsqrt.f32 %v1648_v52  ;;  %vm1656_vm10 = vweird.f32 %v1648_v52 }
0x113a   :  { %v1988_v38 = vpop.eup %1987 }
0x113b   :  { %v1651_v30 = vmul.f32 %v1988_v38, %v1648_v52  ;;  %vm1657_vm7 = vweird.f32 %v1988_v38 }
0x113c   :  { %vm1658_vm3 = vmor %vm1656_vm10, %vm1657_vm7 }
0x113d   :  { %v1652_v39 = vmul.f32 %v1988_v38, %v1651_v30 }
0x113f   :  { %v1653_v40 = vmul.f32 0.5, %v1652_v39 }
0x1141   :  { %v1654_v41 = vsub.f32 1.5, %v1653_v40 }
0x1143   :  { %v1655_v7 = vmul.f32 %v1988_v38, %v1654_v41 }
0x1145   :  { %v1659_v46 = vsel %vm1658_vm3, %v1988_v38, %v1655_v7 }
0x1146   :  { %v1670_v49 = vmul.f32 %v1659_v46, %v1636_v28 }
0x1148   :  { %v1673_v54 = vmul.f32 %v1672_v48, %v1670_v49 }
0x1149   :  { %v1645_v57 = vpop.xlane.xlu2 %1644 }
0x114a   :  { %v1647_v43 = vmul.f32 %v1645_v57, %v2211_v10  ;;  %v1676_v62 = vadd.f32 %v1675_v55, %v1673_v54 }
0x114c   :  { %v1649_v45 = vadd.f32 1e-05, %v1647_v43  ;;  %v1680_v1 = vand.u32 2147483647, %v1676_v62  ;;  %vm1678_vm12 = vcmp.ne.f32.partialorder %v1676_v62, %v1676_v62 }
0x114e   :  { %1989 = vrsqrt.f32 %v1649_v45  ;;  %vm1666_vm5 = vweird.f32 %v1649_v45  ;;  %vm1682_vm11 = vcmp.eq.f32.partialorder %v1680_v1, inf }
0x114f   :  { %vm1684_vm13 = vmor %vm1678_vm12, %vm1682_vm11 }
0x1150   :  { %v1686_v37 = vsel %vm1684_vm13, 1.0, %v2141_v53 }
0x1151   :  { %v1688_v8 = vsel %vm97_vm0, %v1686_v37, -inf }
0x1154   :  { %v1990_v50 = vpop.eup %1989 }
0x1155   :  { %v1661_v51 = vmul.f32 %v1990_v50, %v1649_v45  ;;  %vm1667_vm4 = vweird.f32 %v1990_v50 }
0x1156   :  { %vm1668_vm6 = vmor %vm1666_vm5, %vm1667_vm4 }
0x1157   :  { %v1662_v56 = vmul.f32 %v1990_v50, %v1661_v51 }
0x1159   :  { %v1663_v61 = vmul.f32 0.5, %v1662_v56 }
0x115b   :  { %v1664_v58 = vsub.f32 1.5, %v1663_v61 }
0x115d   :  { %v1665_v10 = vmul.f32 %v1990_v50, %v1664_v58 }
0x115f   :  { %v1669_v2 = vsel %vm1668_vm6, %v1990_v50, %v1665_v10 }
0x1160   :  { %v1671_v3 = vmul.f32 %v1669_v2, %v1637_v33 }
0x1162   :  { %v1674_v4 = vmul.f32 %v1672_v48, %v1671_v3 }
0x1164   :  { %v1677_v5 = vadd.f32 %v1675_v55, %v1674_v4 }
0x1166   :  { %v1681_v6 = vand.u32 2147483647, %v1677_v5  ;;  %vm1679_vm14 = vcmp.ne.f32.partialorder %v1677_v5, %v1677_v5  ;;  %v1820_v17 = vclamps-f32 %v1677_v5, 3.4028235e+38 }
0x1168   :  { %vm1683_vm15 = vcmp.eq.f32.partialorder %v1681_v6, inf }
0x1169   :  { %vm1685_vm1 = vmor %vm1679_vm14, %vm1683_vm15 }
0x116a   :  { %v1687_v0 = vsel %vm1685_vm1, 1.0, %v2141_v53  ;;  %v1819_v53 = vclamps-f32 %v1676_v62, 3.4028235e+38 }
0x116b   :  { %v1689_v9 = vsel %vm97_vm0, %v1687_v0, -inf }
0x116c   :  { %v1690_v11 = vmax.f32 %v1688_v8, %v1689_v9 }
0x116e   :  { %1691 = vmax.xlane.f32.xlu1 %v1690_v11 }
0x11e1   :  { %v1692_v12 = vpop.xlane.xlu1 %1691 }
0x11e2   :  { %v1693_v13 = vrot.slane %v1692_v12, 4 }
0x11e4   :  { %v1694_v63 = vmax.f32 %v1692_v12, %v1693_v13 }
0x11e6   :  { %v1695_v14 = vrot.slane %v1694_v63, 2 }
0x11e8   :  { %v1696_v42 = vmax.f32 %v1694_v63, %v1695_v14 }
0x11ea   :  { %v1697_v15 = vrot.slane %v1696_v42, 1 }
0x11ec   :  { %v1698_v16 = vmax.f32 %v1696_v42, %v1697_v15 }
0x11ee   :  { %1823 = vpush %v1698_v16 }
0x121f   :  { %s1824_s6 = spop %1823 }
0x1220   :  { %p1700_p1 = scmp.gt.f32.partialorder %s1824_s6, 0.5 }
0x1222   :  { %s1705_s15 = scalar_select %p1700_p1, 1, 0 }
0x1224   :  { %v1706_v18 = vstv %s1705_s15 }
0x1225   :  { %vm1707_vm2 = vcmp.eq.s32.totalorder %v1706_v18, 1 }
0x1226   :  { %v1708_v19 = vsel %vm1707_vm2, %v1819_v53, %v1676_v62  ;;  %v1709_v20 = vsel %vm1707_vm2, %v1820_v17, %v1677_v5 }
0x1227   :  { %1710 = vst.msk [vmem:[#allocation10] sm:$0xff] %vm97_vm0, %v1708_v19 }
0x1228   :  { %1711 = vst.msk [vmem:[#allocation10 + $0x8] sm:$0xff] %vm97_vm0, %v1709_v20 }
0x1229   :  { %1724 = dma.vmem_to_hbm [thread:$0]  %s1717_s17, 256, %s1719_s1, [#allocation4], %s2122_s13, %s2122_s13, %s2123_s14  }
0x122a   :  { %2119 = dma.done.wait [#allocation4], 256  }
0x122b   :  { %2120 = vsyncadd [#allocation4], 4294967040 }
0x122c   :  { %1729 = vsyncpa [#allocation3], 1 }
0x122d   :  { %1730 = vsyncpa [#allocation6], 1 }
0x122e   :  { %1731 = vsyncpa [#allocation9], 1 }
0x122f   :  { %1732 = vsyncpa [#allocation4], 1 }

</bundles_post_ra>
